<compile_context>
chip_gen: v5e
topology: v5e:2x2
jax: 0.10.0
libtpu: 0.0.40
codegen_flags: <defaults>
</compile_context>

<pallas_src>
import jax
import jax.numpy as jnp
from jax.experimental import pallas as pl
from jax.experimental.pallas import tpu as pltpu


# ---------------------------------------------------------------------------
# Weight reshaping helpers (tiny, run once per call in XLA)
# ---------------------------------------------------------------------------
def _conv_w_to_mat(w_oihw):
    """(Cout, Cin, KH, KW) -> (KH*KW*Cin, Cout); rows ordered tap-major then Cin."""
    cout, cin, kh, kw = w_oihw.shape
    return jnp.transpose(w_oihw, (2, 3, 1, 0)).reshape(kh * kw * cin, cout)


def _subpixel_w_mat(w_t):
    """Sub-pixel GEMM matrix for ConvTranspose2d(k=3, s=2, p=1, output_padding=1).

    w_t: (Cin, Cout, 3, 3) -> (4*Cin, 4*Cout) with
      rows    (a*2+b)*Cin + ci     (a, b  = 2x2 valid-conv tap offsets)
      columns (di*2+dj)*Cout + co  (di,dj = output sub-pixel parity)
    so  out[co, 2h+di, 2w+dj] = sum_{ci,a,b} xpad[h+a, w+b, ci] * W[row, col]
    with xpad = input padded by one zero row/col on bottom/right.
    """
    cin, cout = w_t.shape[0], w_t.shape[1]

    def kidx(d, a):
        # kernel tap contributing to output parity d from input offset a
        if d == 0:
            return 1 if a == 0 else None
        return 2 if a == 0 else 0

    cols = []
    for di in range(2):
        for dj in range(2):
            rows = []
            for a in range(2):
                for b in range(2):
                    kh, kw = kidx(di, a), kidx(dj, b)
                    if kh is None or kw is None:
                        rows.append(jnp.zeros((cin, cout), w_t.dtype))
                    else:
                        rows.append(w_t[:, :, kh, kw])          # (Cin, Cout)
            cols.append(jnp.concatenate(rows, axis=0))          # (4*Cin, Cout)
    return jnp.concatenate(cols, axis=1)                        # (4*Cin, 4*Cout)


# ---------------------------------------------------------------------------
# Fused forward-pass kernel (one grid step == one image)
# ---------------------------------------------------------------------------
def _make_fused_kernel(Ho, Wo, Cin):
    M = Ho * Wo

    def gemm_bias_relu(taps, w, b):
        # taps: list of (Ho, Wo, Cc) slabs; w: (num_taps*Cc, Cout); b: (1, Cout)
        cc = taps[0].shape[-1]
        acc = jnp.zeros((M, w.shape[-1]), jnp.float32)
        for t, tap in enumerate(taps):
            acc = acc + jnp.dot(tap.reshape(M, cc), w[t * cc:(t + 1) * cc, :],
                                preferred_element_type=jnp.float32)
        return jnp.maximum(acc + b, 0.0).reshape(Ho, Wo, -1)

    def pad_hw(act, top, bottom, left_blk, right_blk):
        # top/bottom: zero rows on the leading (H) axis (always safe);
        # left_blk/right_blk: number of 8-wide zero blocks on the W (sublane) axis,
        # keeping every concat operand sublane-aligned.
        h, w, c = act.shape
        parts = []
        if left_blk:
            parts.append(jnp.zeros((h, 8 * left_blk, c), act.dtype))
        parts.append(act)
        if right_blk:
            parts.append(jnp.zeros((h, 8 * right_blk, c), act.dtype))
        if len(parts) > 1:
            act = jnp.concatenate(parts, axis=1)
        h, w, c = act.shape
        parts = []
        if top:
            parts.append(jnp.zeros((top, w, c), act.dtype))
        parts.append(act)
        if bottom:
            parts.append(jnp.zeros((bottom, w, c), act.dtype))
        if len(parts) > 1:
            act = jnp.concatenate(parts, axis=0)
        return act

    def kernel(x_ref, w1_ref, b1_ref, w2_ref, b2_ref, w3_ref, b3_ref,
               w4_ref, b4_ref, o_ref):
        x = x_ref[...]                       # (Ho+1, Wo+1, 4*Cin) parity planes (HWC)

        # ---- enc1: Conv2d(Cin->8, k3, s2, p1) + ReLU (stride via parity planes) ----
        taps = []
        for kh in range(3):
            for kw in range(3):
                pc = (kh % 2) * 2 + (kw % 2)
                taps.append(x[kh // 2:kh // 2 + Ho, kw // 2:kw // 2 + Wo,
                              pc * Cin:(pc + 1) * Cin])
        a1 = gemm_bias_relu(taps, w1_ref[...], b1_ref[...])        # (Ho, Wo, 8)

        # ---- enc2: Conv2d(8->3, k3, s1, p1) + ReLU ----
        xp = pad_hw(a1, 1, 1, 1, 1)          # data at rows 1..Ho, cols 8..Wo+7
        taps = [xp[kh:kh + Ho, 7 + kw:7 + kw + Wo, :]
                for kh in range(3) for kw in range(3)]
        a2 = gemm_bias_relu(taps, w2_ref[...], b2_ref[...])        # (Ho, Wo, 3)

        # ---- dec1: ConvTranspose2d(3->8, k3, s1, p1) + ReLU == conv(flipped W, p1) --
        xp = pad_hw(a2, 1, 1, 1, 1)
        taps = [xp[kh:kh + Ho, 7 + kw:7 + kw + Wo, :]
                for kh in range(3) for kw in range(3)]
        a3 = gemm_bias_relu(taps, w3_ref[...], b3_ref[...])        # (Ho, Wo, 8)

        # ---- dec2: ConvTranspose2d(8->3, k3, s2, p1, op1) + ReLU, sub-pixel form ----
        xp = pad_hw(a3, 0, 1, 0, 1)          # bottom/right zero pad
        taps = [xp[a:a + Ho, b:b + Wo, :] for a in range(2) for b in range(2)]
        a4 = gemm_bias_relu(taps, w4_ref[...], b4_ref[...])        # (Ho, Wo, 12)

        o_ref[...] = a4

    return kernel


# ---------------------------------------------------------------------------
# Public forward pass (NCHW in / NCHW out, like PyTorch)
# ---------------------------------------------------------------------------
@jax.jit
def autoencoder_forward(params, x):
    n, cin, h, w = x.shape
    ho, wo = h // 2, w // 2

    # Input prep (one tiny XLA transform of the kernel *input*):
    # semantic pad-1 then space-to-depth to parity planes in HWC layout:
    #   xs[n, i, j, (p*2+q)*Cin + ci] = xpad[n, ci, 2i+p, 2j+q]
    xpad = jnp.pad(x, ((0, 0), (0, 0), (1, 1), (1, 1)))
    xs = xpad.reshape(n, cin, ho + 1, 2, wo + 1, 2)
    xs = jnp.transpose(xs, (0, 2, 4, 3, 5, 1)).reshape(n, ho + 1, wo + 1, 4 * cin)

    # Weights / biases -> GEMM form (tiny, resident in VMEM during the kernel).
    w1 = _conv_w_to_mat(params["enc1_w"])                                     # (27, 8)
    w2 = _conv_w_to_mat(params["enc2_w"])                                     # (72, 3)
    w3 = _conv_w_to_mat(
        jnp.transpose(params["dec1_w"][:, :, ::-1, ::-1], (1, 0, 2, 3)))      # (27, 8)
    w4 = _subpixel_w_mat(params["dec2_w"])                                    # (32, 12)
    b1 = params["enc1_b"].reshape(1, -1)
    b2 = params["enc2_b"].reshape(1, -1)
    b3 = params["dec1_b"].reshape(1, -1)
    b4 = jnp.tile(params["dec2_b"], 4).reshape(1, -1)
    cout_sub = b4.shape[-1]                                                   # 12

    def resident(arr):
        nd = arr.ndim
        return pl.BlockSpec(arr.shape, lambda i: (0,) * nd)

    yk = pl.pallas_call(
        _make_fused_kernel(ho, wo, cin),
        out_shape=jax.ShapeDtypeStruct((n, ho, wo, cout_sub), jnp.float32),
        grid=(n,),
        in_specs=[
            pl.BlockSpec((None, ho + 1, wo + 1, 4 * cin), lambda i: (i, 0, 0, 0)),
            resident(w1), resident(b1),
            resident(w2), resident(b2),
            resident(w3), resident(b3),
            resident(w4), resident(b4),
        ],
        out_specs=pl.BlockSpec((None, ho, wo, cout_sub), lambda i: (i, 0, 0, 0)),
        compiler_params=pltpu.CompilerParams(dimension_semantics=("parallel",)),
    )(xs, w1, b1, w2, b2, w3, b3, w4, b4)

    # TODO(synk): depth-to-space + NHWC->NCHW stays as one tiny XLA transpose on the
    # ~6 KB output (an in-kernel lane-interleaved store is not worth the relayout risk).
    y = yk.reshape(n, ho, wo, 2, 2, 3)
    y = jnp.transpose(y, (0, 5, 1, 3, 2, 4)).reshape(n, 3, h, w)
    return y


# ---------------------------------------------------------------------------
# Parameter init (PyTorch-like uniform) and a pure-XLA reference for validation
# ---------------------------------------------------------------------------
def init_params(key):
    def uniform(k, shape, fan_in):
        bound = 1.0 / (fan_in ** 0.5)
        return jax.random.uniform(k, shape, jnp.float32, -bound, bound)

    ks = jax.random.split(key, 8)
    return {
        # Conv2d weights: (Cout, Cin, KH, KW)
        "enc1_w": uniform(ks[0], (8, 3, 3, 3), 3 * 9),
        "enc1_b": uniform(ks[1], (8,), 3 * 9),
        "enc2_w": uniform(ks[2], (3, 8, 3, 3), 8 * 9),
        "enc2_b": uniform(ks[3], (3,), 8 * 9),
        # ConvTranspose2d weights: (Cin, Cout, KH, KW)
        "dec1_w": uniform(ks[4], (3, 8, 3, 3), 8 * 9),
        "dec1_b": uniform(ks[5], (8,), 8 * 9),
        "dec2_w": uniform(ks[6], (8, 3, 3, 3), 3 * 9),
        "dec2_b": uniform(ks[7], (3,), 3 * 9),
    }


def _ref_forward(params, x):
    dn = ("NCHW", "OIHW", "NCHW")
    prec = jax.lax.Precision.HIGHEST

    def conv(x, w, b, stride, pad):
        y = jax.lax.conv_general_dilated(
            x, w, (stride, stride), [(pad, pad)] * 2,
            dimension_numbers=dn, precision=prec)
        return jax.nn.relu(y + b.reshape(1, -1, 1, 1))

    def tconv(x, w_t, b, stride, pad, opad):
        k = w_t.shape[2]
        w_conv = jnp.transpose(w_t[:, :, ::-1, ::-1], (1, 0, 2, 3))
        y = jax.lax.conv_general_dilated(
            x, w_conv, (1, 1), [(k - 1 - pad, k - 1 - pad + opad)] * 2,
            lhs_dilation=(stride, stride), dimension_numbers=dn, precision=prec)
        return jax.nn.relu(y + b.reshape(1, -1, 1, 1))

    x = conv(x, params["enc1_w"], params["enc1_b"], 2, 1)
    x = conv(x, params["enc2_w"], params["enc2_b"], 1, 1)
    x = tconv(x, params["dec1_w"], params["dec1_b"], 1, 1, 0)
    x = tconv(x, params["dec2_w"], params["dec2_b"], 2, 1, 1)
    return x


if __name__ == "__main__":
    x = jax.random.normal(jax.random.PRNGKey(0), (2, 3, 16, 16), jnp.float32)
    params = init_params(jax.random.PRNGKey(1))

    y = jax.block_until_ready(autoencoder_forward(params, x))
    assert y.shape == (2, 3, 16, 16), y.shape

    y_ref = _ref_forward(params, x)
    err = float(jnp.max(jnp.abs(y - y_ref)))
    assert err < 5e-2, f"max abs error vs XLA reference: {err}"

    print("KERNEL_OK")
</pallas_src>

<mosaic_0001>
module attributes {stable_mosaic.version = 11 : i64} {
  func.func @kernel(%arg0: i32, %arg1: memref<1x9x9x12xf32, #tpu.memory_space<vmem>>, %arg2: memref<27x8xf32, #tpu.memory_space<vmem>>, %arg3: memref<1x8xf32, #tpu.memory_space<vmem>>, %arg4: memref<72x3xf32, #tpu.memory_space<vmem>>, %arg5: memref<1x3xf32, #tpu.memory_space<vmem>>, %arg6: memref<27x8xf32, #tpu.memory_space<vmem>>, %arg7: memref<1x8xf32, #tpu.memory_space<vmem>>, %arg8: memref<32x12xf32, #tpu.memory_space<vmem>>, %arg9: memref<1x12xf32, #tpu.memory_space<vmem>>, %arg10: memref<1x8x8x12xf32, #tpu.memory_space<vmem>>) attributes {dimension_semantics = [#tpu.dimension_semantics<parallel>], iteration_bounds = array<i64: 2>, scalar_prefetch = 0 : i64, scratch_operands = 0 : i64, tpu.core_type = #tpu.core_type<tc>, window_params = [{transform_indices = @transform_0, window_bounds = array<i64: 1, 9, 9, 12>}, {pipeline_mode = #tpu.pipeline_mode<synchronous>, transform_indices = @transform_1, window_bounds = array<i64: 27, 8>}, {pipeline_mode = #tpu.pipeline_mode<synchronous>, transform_indices = @transform_2, window_bounds = array<i64: 1, 8>}, {pipeline_mode = #tpu.pipeline_mode<synchronous>, transform_indices = @transform_3, window_bounds = array<i64: 72, 3>}, {pipeline_mode = #tpu.pipeline_mode<synchronous>, transform_indices = @transform_4, window_bounds = array<i64: 1, 3>}, {pipeline_mode = #tpu.pipeline_mode<synchronous>, transform_indices = @transform_5, window_bounds = array<i64: 27, 8>}, {pipeline_mode = #tpu.pipeline_mode<synchronous>, transform_indices = @transform_6, window_bounds = array<i64: 1, 8>}, {pipeline_mode = #tpu.pipeline_mode<synchronous>, transform_indices = @transform_7, window_bounds = array<i64: 32, 12>}, {pipeline_mode = #tpu.pipeline_mode<synchronous>, transform_indices = @transform_8, window_bounds = array<i64: 1, 12>}, {transform_indices = @transform_9, window_bounds = array<i64: 1, 8, 8, 12>}]} {
    %c0 = arith.constant 0 : index
    %c0_0 = arith.constant 0 : index
    %c0_1 = arith.constant 0 : index
    %c0_2 = arith.constant 0 : index
    %0 = vector.load %arg1[%c0, %c0_0, %c0_1, %c0_2] : memref<1x9x9x12xf32, #tpu.memory_space<vmem>>, vector<1x9x9x12xf32>
    %1 = vector.shape_cast %0 : vector<1x9x9x12xf32> to vector<9x9x12xf32>
    %2 = vector.extract_strided_slice %1 {offsets = [0, 0, 0], sizes = [8, 8, 3], strides = [1, 1, 1]} : vector<9x9x12xf32> to vector<8x8x3xf32>
    %3 = vector.extract_strided_slice %1 {offsets = [0, 0, 3], sizes = [8, 8, 3], strides = [1, 1, 1]} : vector<9x9x12xf32> to vector<8x8x3xf32>
    %4 = vector.extract_strided_slice %1 {offsets = [0, 1, 0], sizes = [8, 8, 3], strides = [1, 1, 1]} : vector<9x9x12xf32> to vector<8x8x3xf32>
    %5 = vector.extract_strided_slice %1 {offsets = [0, 0, 6], sizes = [8, 8, 3], strides = [1, 1, 1]} : vector<9x9x12xf32> to vector<8x8x3xf32>
    %6 = vector.extract_strided_slice %1 {offsets = [0, 0, 9], sizes = [8, 8, 3], strides = [1, 1, 1]} : vector<9x9x12xf32> to vector<8x8x3xf32>
    %7 = vector.extract_strided_slice %1 {offsets = [0, 1, 6], sizes = [8, 8, 3], strides = [1, 1, 1]} : vector<9x9x12xf32> to vector<8x8x3xf32>
    %8 = vector.extract_strided_slice %1 {offsets = [1, 0, 0], sizes = [8, 8, 3], strides = [1, 1, 1]} : vector<9x9x12xf32> to vector<8x8x3xf32>
    %9 = vector.extract_strided_slice %1 {offsets = [1, 0, 3], sizes = [8, 8, 3], strides = [1, 1, 1]} : vector<9x9x12xf32> to vector<8x8x3xf32>
    %10 = vector.extract_strided_slice %1 {offsets = [1, 1, 0], sizes = [8, 8, 3], strides = [1, 1, 1]} : vector<9x9x12xf32> to vector<8x8x3xf32>
    %c0_3 = arith.constant 0 : index
    %c0_4 = arith.constant 0 : index
    %11 = vector.load %arg2[%c0_3, %c0_4] : memref<27x8xf32, #tpu.memory_space<vmem>>, vector<27x8xf32>
    %c0_5 = arith.constant 0 : index
    %c0_6 = arith.constant 0 : index
    %12 = vector.load %arg3[%c0_5, %c0_6] : memref<1x8xf32, #tpu.memory_space<vmem>>, vector<1x8xf32>
    %cst = arith.constant 0.000000e+00 : f32
    %13 = vector.broadcast %cst : f32 to vector<64x8xf32>
    %14 = vector.shape_cast %2 : vector<8x8x3xf32> to vector<64x3xf32>
    %15 = vector.extract_strided_slice %11 {offsets = [0, 0], sizes = [3, 8], strides = [1, 1]} : vector<27x8xf32> to vector<3x8xf32>
    %cst_7 = arith.constant dense<0.000000e+00> : vector<64x8xf32>
    %16 = tpu.matmul %14, %15, %cst_7 {dimension_numbers = #tpu.dot_dimension_numbers<[1], [0], [0], [1], [0, 0, 1, 1], [], []>} : vector<64x3xf32>, vector<3x8xf32>, vector<64x8xf32> -> vector<64x8xf32>
    %17 = arith.addf %13, %16 : vector<64x8xf32>
    %18 = vector.shape_cast %3 : vector<8x8x3xf32> to vector<64x3xf32>
    %19 = vector.extract_strided_slice %11 {offsets = [3, 0], sizes = [3, 8], strides = [1, 1]} : vector<27x8xf32> to vector<3x8xf32>
    %cst_8 = arith.constant dense<0.000000e+00> : vector<64x8xf32>
    %20 = tpu.matmul %18, %19, %cst_8 {dimension_numbers = #tpu.dot_dimension_numbers<[1], [0], [0], [1], [0, 0, 1, 1], [], []>} : vector<64x3xf32>, vector<3x8xf32>, vector<64x8xf32> -> vector<64x8xf32>
    %21 = arith.addf %17, %20 : vector<64x8xf32>
    %22 = vector.shape_cast %4 : vector<8x8x3xf32> to vector<64x3xf32>
    %23 = vector.extract_strided_slice %11 {offsets = [6, 0], sizes = [3, 8], strides = [1, 1]} : vector<27x8xf32> to vector<3x8xf32>
    %cst_9 = arith.constant dense<0.000000e+00> : vector<64x8xf32>
    %24 = tpu.matmul %22, %23, %cst_9 {dimension_numbers = #tpu.dot_dimension_numbers<[1], [0], [0], [1], [0, 0, 1, 1], [], []>} : vector<64x3xf32>, vector<3x8xf32>, vector<64x8xf32> -> vector<64x8xf32>
    %25 = arith.addf %21, %24 : vector<64x8xf32>
    %26 = vector.shape_cast %5 : vector<8x8x3xf32> to vector<64x3xf32>
    %27 = vector.extract_strided_slice %11 {offsets = [9, 0], sizes = [3, 8], strides = [1, 1]} : vector<27x8xf32> to vector<3x8xf32>
    %cst_10 = arith.constant dense<0.000000e+00> : vector<64x8xf32>
    %28 = tpu.matmul %26, %27, %cst_10 {dimension_numbers = #tpu.dot_dimension_numbers<[1], [0], [0], [1], [0, 0, 1, 1], [], []>} : vector<64x3xf32>, vector<3x8xf32>, vector<64x8xf32> -> vector<64x8xf32>
    %29 = arith.addf %25, %28 : vector<64x8xf32>
    %30 = vector.shape_cast %6 : vector<8x8x3xf32> to vector<64x3xf32>
    %31 = vector.extract_strided_slice %11 {offsets = [12, 0], sizes = [3, 8], strides = [1, 1]} : vector<27x8xf32> to vector<3x8xf32>
    %cst_11 = arith.constant dense<0.000000e+00> : vector<64x8xf32>
    %32 = tpu.matmul %30, %31, %cst_11 {dimension_numbers = #tpu.dot_dimension_numbers<[1], [0], [0], [1], [0, 0, 1, 1], [], []>} : vector<64x3xf32>, vector<3x8xf32>, vector<64x8xf32> -> vector<64x8xf32>
    %33 = arith.addf %29, %32 : vector<64x8xf32>
    %34 = vector.shape_cast %7 : vector<8x8x3xf32> to vector<64x3xf32>
    %35 = vector.extract_strided_slice %11 {offsets = [15, 0], sizes = [3, 8], strides = [1, 1]} : vector<27x8xf32> to vector<3x8xf32>
    %cst_12 = arith.constant dense<0.000000e+00> : vector<64x8xf32>
    %36 = tpu.matmul %34, %35, %cst_12 {dimension_numbers = #tpu.dot_dimension_numbers<[1], [0], [0], [1], [0, 0, 1, 1], [], []>} : vector<64x3xf32>, vector<3x8xf32>, vector<64x8xf32> -> vector<64x8xf32>
    %37 = arith.addf %33, %36 : vector<64x8xf32>
    %38 = vector.shape_cast %8 : vector<8x8x3xf32> to vector<64x3xf32>
    %39 = vector.extract_strided_slice %11 {offsets = [18, 0], sizes = [3, 8], strides = [1, 1]} : vector<27x8xf32> to vector<3x8xf32>
    %cst_13 = arith.constant dense<0.000000e+00> : vector<64x8xf32>
    %40 = tpu.matmul %38, %39, %cst_13 {dimension_numbers = #tpu.dot_dimension_numbers<[1], [0], [0], [1], [0, 0, 1, 1], [], []>} : vector<64x3xf32>, vector<3x8xf32>, vector<64x8xf32> -> vector<64x8xf32>
    %41 = arith.addf %37, %40 : vector<64x8xf32>
    %42 = vector.shape_cast %9 : vector<8x8x3xf32> to vector<64x3xf32>
    %43 = vector.extract_strided_slice %11 {offsets = [21, 0], sizes = [3, 8], strides = [1, 1]} : vector<27x8xf32> to vector<3x8xf32>
    %cst_14 = arith.constant dense<0.000000e+00> : vector<64x8xf32>
    %44 = tpu.matmul %42, %43, %cst_14 {dimension_numbers = #tpu.dot_dimension_numbers<[1], [0], [0], [1], [0, 0, 1, 1], [], []>} : vector<64x3xf32>, vector<3x8xf32>, vector<64x8xf32> -> vector<64x8xf32>
    %45 = arith.addf %41, %44 : vector<64x8xf32>
    %46 = vector.shape_cast %10 : vector<8x8x3xf32> to vector<64x3xf32>
    %47 = vector.extract_strided_slice %11 {offsets = [24, 0], sizes = [3, 8], strides = [1, 1]} : vector<27x8xf32> to vector<3x8xf32>
    %cst_15 = arith.constant dense<0.000000e+00> : vector<64x8xf32>
    %48 = tpu.matmul %46, %47, %cst_15 {dimension_numbers = #tpu.dot_dimension_numbers<[1], [0], [0], [1], [0, 0, 1, 1], [], []>} : vector<64x3xf32>, vector<3x8xf32>, vector<64x8xf32> -> vector<64x8xf32>
    %49 = arith.addf %45, %48 : vector<64x8xf32>
    %50 = vector.broadcast %12 : vector<1x8xf32> to vector<64x8xf32>
    %51 = arith.addf %49, %50 : vector<64x8xf32>
    %cst_16 = arith.constant 0.000000e+00 : f32
    %52 = vector.broadcast %cst_16 : f32 to vector<64x8xf32>
    %53 = arith.maximumf %51, %52 : vector<64x8xf32>
    %54 = vector.shape_cast %53 : vector<64x8xf32> to vector<8x8x8xf32>
    %cst_17 = arith.constant 0.000000e+00 : f32
    %55 = vector.broadcast %cst_17 : f32 to vector<8x8x8xf32>
    %cst_18 = arith.constant 0.000000e+00 : f32
    %56 = vector.broadcast %cst_18 : f32 to vector<8x8x8xf32>
    %57 = tpu.concatenate %55, %54, %56 in 1 : vector<8x8x8xf32>, vector<8x8x8xf32>, vector<8x8x8xf32> -> vector<8x24x8xf32>
    %cst_19 = arith.constant 0.000000e+00 : f32
    %58 = vector.broadcast %cst_19 : f32 to vector<1x24x8xf32>
    %cst_20 = arith.constant 0.000000e+00 : f32
    %59 = vector.broadcast %cst_20 : f32 to vector<1x24x8xf32>
    %60 = tpu.concatenate %58, %57, %59 in 0 : vector<1x24x8xf32>, vector<8x24x8xf32>, vector<1x24x8xf32> -> vector<10x24x8xf32>
    %61 = vector.extract_strided_slice %60 {offsets = [0, 7, 0], sizes = [8, 8, 8], strides = [1, 1, 1]} : vector<10x24x8xf32> to vector<8x8x8xf32>
    %62 = vector.extract_strided_slice %60 {offsets = [0, 8, 0], sizes = [8, 8, 8], strides = [1, 1, 1]} : vector<10x24x8xf32> to vector<8x8x8xf32>
    %63 = vector.extract_strided_slice %60 {offsets = [0, 9, 0], sizes = [8, 8, 8], strides = [1, 1, 1]} : vector<10x24x8xf32> to vector<8x8x8xf32>
    %64 = vector.extract_strided_slice %60 {offsets = [1, 7, 0], sizes = [8, 8, 8], strides = [1, 1, 1]} : vector<10x24x8xf32> to vector<8x8x8xf32>
    %65 = vector.extract_strided_slice %60 {offsets = [1, 8, 0], sizes = [8, 8, 8], strides = [1, 1, 1]} : vector<10x24x8xf32> to vector<8x8x8xf32>
    %66 = vector.extract_strided_slice %60 {offsets = [1, 9, 0], sizes = [8, 8, 8], strides = [1, 1, 1]} : vector<10x24x8xf32> to vector<8x8x8xf32>
    %67 = vector.extract_strided_slice %60 {offsets = [2, 7, 0], sizes = [8, 8, 8], strides = [1, 1, 1]} : vector<10x24x8xf32> to vector<8x8x8xf32>
    %68 = vector.extract_strided_slice %60 {offsets = [2, 8, 0], sizes = [8, 8, 8], strides = [1, 1, 1]} : vector<10x24x8xf32> to vector<8x8x8xf32>
    %69 = vector.extract_strided_slice %60 {offsets = [2, 9, 0], sizes = [8, 8, 8], strides = [1, 1, 1]} : vector<10x24x8xf32> to vector<8x8x8xf32>
    %c0_21 = arith.constant 0 : index
    %c0_22 = arith.constant 0 : index
    %70 = vector.load %arg4[%c0_21, %c0_22] : memref<72x3xf32, #tpu.memory_space<vmem>>, vector<72x3xf32>
    %c0_23 = arith.constant 0 : index
    %c0_24 = arith.constant 0 : index
    %71 = vector.load %arg5[%c0_23, %c0_24] : memref<1x3xf32, #tpu.memory_space<vmem>>, vector<1x3xf32>
    %cst_25 = arith.constant 0.000000e+00 : f32
    %72 = vector.broadcast %cst_25 : f32 to vector<64x3xf32>
    %73 = vector.shape_cast %61 : vector<8x8x8xf32> to vector<64x8xf32>
    %74 = vector.extract_strided_slice %70 {offsets = [0, 0], sizes = [8, 3], strides = [1, 1]} : vector<72x3xf32> to vector<8x3xf32>
    %cst_26 = arith.constant dense<0.000000e+00> : vector<64x3xf32>
    %75 = tpu.matmul %73, %74, %cst_26 {dimension_numbers = #tpu.dot_dimension_numbers<[1], [0], [0], [1], [0, 0, 1, 1], [], []>} : vector<64x8xf32>, vector<8x3xf32>, vector<64x3xf32> -> vector<64x3xf32>
    %76 = arith.addf %72, %75 : vector<64x3xf32>
    %77 = vector.shape_cast %62 : vector<8x8x8xf32> to vector<64x8xf32>
    %78 = vector.extract_strided_slice %70 {offsets = [8, 0], sizes = [8, 3], strides = [1, 1]} : vector<72x3xf32> to vector<8x3xf32>
    %cst_27 = arith.constant dense<0.000000e+00> : vector<64x3xf32>
    %79 = tpu.matmul %77, %78, %cst_27 {dimension_numbers = #tpu.dot_dimension_numbers<[1], [0], [0], [1], [0, 0, 1, 1], [], []>} : vector<64x8xf32>, vector<8x3xf32>, vector<64x3xf32> -> vector<64x3xf32>
    %80 = arith.addf %76, %79 : vector<64x3xf32>
    %81 = vector.shape_cast %63 : vector<8x8x8xf32> to vector<64x8xf32>
    %82 = vector.extract_strided_slice %70 {offsets = [16, 0], sizes = [8, 3], strides = [1, 1]} : vector<72x3xf32> to vector<8x3xf32>
    %cst_28 = arith.constant dense<0.000000e+00> : vector<64x3xf32>
    %83 = tpu.matmul %81, %82, %cst_28 {dimension_numbers = #tpu.dot_dimension_numbers<[1], [0], [0], [1], [0, 0, 1, 1], [], []>} : vector<64x8xf32>, vector<8x3xf32>, vector<64x3xf32> -> vector<64x3xf32>
    %84 = arith.addf %80, %83 : vector<64x3xf32>
    %85 = vector.shape_cast %64 : vector<8x8x8xf32> to vector<64x8xf32>
    %86 = vector.extract_strided_slice %70 {offsets = [24, 0], sizes = [8, 3], strides = [1, 1]} : vector<72x3xf32> to vector<8x3xf32>
    %cst_29 = arith.constant dense<0.000000e+00> : vector<64x3xf32>
    %87 = tpu.matmul %85, %86, %cst_29 {dimension_numbers = #tpu.dot_dimension_numbers<[1], [0], [0], [1], [0, 0, 1, 1], [], []>} : vector<64x8xf32>, vector<8x3xf32>, vector<64x3xf32> -> vector<64x3xf32>
    %88 = arith.addf %84, %87 : vector<64x3xf32>
    %89 = vector.shape_cast %65 : vector<8x8x8xf32> to vector<64x8xf32>
    %90 = vector.extract_strided_slice %70 {offsets = [32, 0], sizes = [8, 3], strides = [1, 1]} : vector<72x3xf32> to vector<8x3xf32>
    %cst_30 = arith.constant dense<0.000000e+00> : vector<64x3xf32>
    %91 = tpu.matmul %89, %90, %cst_30 {dimension_numbers = #tpu.dot_dimension_numbers<[1], [0], [0], [1], [0, 0, 1, 1], [], []>} : vector<64x8xf32>, vector<8x3xf32>, vector<64x3xf32> -> vector<64x3xf32>
    %92 = arith.addf %88, %91 : vector<64x3xf32>
    %93 = vector.shape_cast %66 : vector<8x8x8xf32> to vector<64x8xf32>
    %94 = vector.extract_strided_slice %70 {offsets = [40, 0], sizes = [8, 3], strides = [1, 1]} : vector<72x3xf32> to vector<8x3xf32>
    %cst_31 = arith.constant dense<0.000000e+00> : vector<64x3xf32>
    %95 = tpu.matmul %93, %94, %cst_31 {dimension_numbers = #tpu.dot_dimension_numbers<[1], [0], [0], [1], [0, 0, 1, 1], [], []>} : vector<64x8xf32>, vector<8x3xf32>, vector<64x3xf32> -> vector<64x3xf32>
    %96 = arith.addf %92, %95 : vector<64x3xf32>
    %97 = vector.shape_cast %67 : vector<8x8x8xf32> to vector<64x8xf32>
    %98 = vector.extract_strided_slice %70 {offsets = [48, 0], sizes = [8, 3], strides = [1, 1]} : vector<72x3xf32> to vector<8x3xf32>
    %cst_32 = arith.constant dense<0.000000e+00> : vector<64x3xf32>
    %99 = tpu.matmul %97, %98, %cst_32 {dimension_numbers = #tpu.dot_dimension_numbers<[1], [0], [0], [1], [0, 0, 1, 1], [], []>} : vector<64x8xf32>, vector<8x3xf32>, vector<64x3xf32> -> vector<64x3xf32>
    %100 = arith.addf %96, %99 : vector<64x3xf32>
    %101 = vector.shape_cast %68 : vector<8x8x8xf32> to vector<64x8xf32>
    %102 = vector.extract_strided_slice %70 {offsets = [56, 0], sizes = [8, 3], strides = [1, 1]} : vector<72x3xf32> to vector<8x3xf32>
    %cst_33 = arith.constant dense<0.000000e+00> : vector<64x3xf32>
    %103 = tpu.matmul %101, %102, %cst_33 {dimension_numbers = #tpu.dot_dimension_numbers<[1], [0], [0], [1], [0, 0, 1, 1], [], []>} : vector<64x8xf32>, vector<8x3xf32>, vector<64x3xf32> -> vector<64x3xf32>
    %104 = arith.addf %100, %103 : vector<64x3xf32>
    %105 = vector.shape_cast %69 : vector<8x8x8xf32> to vector<64x8xf32>
    %106 = vector.extract_strided_slice %70 {offsets = [64, 0], sizes = [8, 3], strides = [1, 1]} : vector<72x3xf32> to vector<8x3xf32>
    %cst_34 = arith.constant dense<0.000000e+00> : vector<64x3xf32>
    %107 = tpu.matmul %105, %106, %cst_34 {dimension_numbers = #tpu.dot_dimension_numbers<[1], [0], [0], [1], [0, 0, 1, 1], [], []>} : vector<64x8xf32>, vector<8x3xf32>, vector<64x3xf32> -> vector<64x3xf32>
    %108 = arith.addf %104, %107 : vector<64x3xf32>
    %109 = vector.broadcast %71 : vector<1x3xf32> to vector<64x3xf32>
    %110 = arith.addf %108, %109 : vector<64x3xf32>
    %cst_35 = arith.constant 0.000000e+00 : f32
    %111 = vector.broadcast %cst_35 : f32 to vector<64x3xf32>
    %112 = arith.maximumf %110, %111 : vector<64x3xf32>
    %113 = vector.shape_cast %112 : vector<64x3xf32> to vector<8x8x3xf32>
    %cst_36 = arith.constant 0.000000e+00 : f32
    %114 = vector.broadcast %cst_36 : f32 to vector<8x8x3xf32>
    %cst_37 = arith.constant 0.000000e+00 : f32
    %115 = vector.broadcast %cst_37 : f32 to vector<8x8x3xf32>
    %116 = tpu.concatenate %114, %113, %115 in 1 : vector<8x8x3xf32>, vector<8x8x3xf32>, vector<8x8x3xf32> -> vector<8x24x3xf32>
    %cst_38 = arith.constant 0.000000e+00 : f32
    %117 = vector.broadcast %cst_38 : f32 to vector<1x24x3xf32>
    %cst_39 = arith.constant 0.000000e+00 : f32
    %118 = vector.broadcast %cst_39 : f32 to vector<1x24x3xf32>
    %119 = tpu.concatenate %117, %116, %118 in 0 : vector<1x24x3xf32>, vector<8x24x3xf32>, vector<1x24x3xf32> -> vector<10x24x3xf32>
    %120 = vector.extract_strided_slice %119 {offsets = [0, 7, 0], sizes = [8, 8, 3], strides = [1, 1, 1]} : vector<10x24x3xf32> to vector<8x8x3xf32>
    %121 = vector.extract_strided_slice %119 {offsets = [0, 8, 0], sizes = [8, 8, 3], strides = [1, 1, 1]} : vector<10x24x3xf32> to vector<8x8x3xf32>
    %122 = vector.extract_strided_slice %119 {offsets = [0, 9, 0], sizes = [8, 8, 3], strides = [1, 1, 1]} : vector<10x24x3xf32> to vector<8x8x3xf32>
    %123 = vector.extract_strided_slice %119 {offsets = [1, 7, 0], sizes = [8, 8, 3], strides = [1, 1, 1]} : vector<10x24x3xf32> to vector<8x8x3xf32>
    %124 = vector.extract_strided_slice %119 {offsets = [1, 8, 0], sizes = [8, 8, 3], strides = [1, 1, 1]} : vector<10x24x3xf32> to vector<8x8x3xf32>
    %125 = vector.extract_strided_slice %119 {offsets = [1, 9, 0], sizes = [8, 8, 3], strides = [1, 1, 1]} : vector<10x24x3xf32> to vector<8x8x3xf32>
    %126 = vector.extract_strided_slice %119 {offsets = [2, 7, 0], sizes = [8, 8, 3], strides = [1, 1, 1]} : vector<10x24x3xf32> to vector<8x8x3xf32>
    %127 = vector.extract_strided_slice %119 {offsets = [2, 8, 0], sizes = [8, 8, 3], strides = [1, 1, 1]} : vector<10x24x3xf32> to vector<8x8x3xf32>
    %128 = vector.extract_strided_slice %119 {offsets = [2, 9, 0], sizes = [8, 8, 3], strides = [1, 1, 1]} : vector<10x24x3xf32> to vector<8x8x3xf32>
    %c0_40 = arith.constant 0 : index
    %c0_41 = arith.constant 0 : index
    %129 = vector.load %arg6[%c0_40, %c0_41] : memref<27x8xf32, #tpu.memory_space<vmem>>, vector<27x8xf32>
    %c0_42 = arith.constant 0 : index
    %c0_43 = arith.constant 0 : index
    %130 = vector.load %arg7[%c0_42, %c0_43] : memref<1x8xf32, #tpu.memory_space<vmem>>, vector<1x8xf32>
    %cst_44 = arith.constant 0.000000e+00 : f32
    %131 = vector.broadcast %cst_44 : f32 to vector<64x8xf32>
    %132 = vector.shape_cast %120 : vector<8x8x3xf32> to vector<64x3xf32>
    %133 = vector.extract_strided_slice %129 {offsets = [0, 0], sizes = [3, 8], strides = [1, 1]} : vector<27x8xf32> to vector<3x8xf32>
    %cst_45 = arith.constant dense<0.000000e+00> : vector<64x8xf32>
    %134 = tpu.matmul %132, %133, %cst_45 {dimension_numbers = #tpu.dot_dimension_numbers<[1], [0], [0], [1], [0, 0, 1, 1], [], []>} : vector<64x3xf32>, vector<3x8xf32>, vector<64x8xf32> -> vector<64x8xf32>
    %135 = arith.addf %131, %134 : vector<64x8xf32>
    %136 = vector.shape_cast %121 : vector<8x8x3xf32> to vector<64x3xf32>
    %137 = vector.extract_strided_slice %129 {offsets = [3, 0], sizes = [3, 8], strides = [1, 1]} : vector<27x8xf32> to vector<3x8xf32>
    %cst_46 = arith.constant dense<0.000000e+00> : vector<64x8xf32>
    %138 = tpu.matmul %136, %137, %cst_46 {dimension_numbers = #tpu.dot_dimension_numbers<[1], [0], [0], [1], [0, 0, 1, 1], [], []>} : vector<64x3xf32>, vector<3x8xf32>, vector<64x8xf32> -> vector<64x8xf32>
    %139 = arith.addf %135, %138 : vector<64x8xf32>
    %140 = vector.shape_cast %122 : vector<8x8x3xf32> to vector<64x3xf32>
    %141 = vector.extract_strided_slice %129 {offsets = [6, 0], sizes = [3, 8], strides = [1, 1]} : vector<27x8xf32> to vector<3x8xf32>
    %cst_47 = arith.constant dense<0.000000e+00> : vector<64x8xf32>
    %142 = tpu.matmul %140, %141, %cst_47 {dimension_numbers = #tpu.dot_dimension_numbers<[1], [0], [0], [1], [0, 0, 1, 1], [], []>} : vector<64x3xf32>, vector<3x8xf32>, vector<64x8xf32> -> vector<64x8xf32>
    %143 = arith.addf %139, %142 : vector<64x8xf32>
    %144 = vector.shape_cast %123 : vector<8x8x3xf32> to vector<64x3xf32>
    %145 = vector.extract_strided_slice %129 {offsets = [9, 0], sizes = [3, 8], strides = [1, 1]} : vector<27x8xf32> to vector<3x8xf32>
    %cst_48 = arith.constant dense<0.000000e+00> : vector<64x8xf32>
    %146 = tpu.matmul %144, %145, %cst_48 {dimension_numbers = #tpu.dot_dimension_numbers<[1], [0], [0], [1], [0, 0, 1, 1], [], []>} : vector<64x3xf32>, vector<3x8xf32>, vector<64x8xf32> -> vector<64x8xf32>
    %147 = arith.addf %143, %146 : vector<64x8xf32>
    %148 = vector.shape_cast %124 : vector<8x8x3xf32> to vector<64x3xf32>
    %149 = vector.extract_strided_slice %129 {offsets = [12, 0], sizes = [3, 8], strides = [1, 1]} : vector<27x8xf32> to vector<3x8xf32>
    %cst_49 = arith.constant dense<0.000000e+00> : vector<64x8xf32>
    %150 = tpu.matmul %148, %149, %cst_49 {dimension_numbers = #tpu.dot_dimension_numbers<[1], [0], [0], [1], [0, 0, 1, 1], [], []>} : vector<64x3xf32>, vector<3x8xf32>, vector<64x8xf32> -> vector<64x8xf32>
    %151 = arith.addf %147, %150 : vector<64x8xf32>
    %152 = vector.shape_cast %125 : vector<8x8x3xf32> to vector<64x3xf32>
    %153 = vector.extract_strided_slice %129 {offsets = [15, 0], sizes = [3, 8], strides = [1, 1]} : vector<27x8xf32> to vector<3x8xf32>
    %cst_50 = arith.constant dense<0.000000e+00> : vector<64x8xf32>
    %154 = tpu.matmul %152, %153, %cst_50 {dimension_numbers = #tpu.dot_dimension_numbers<[1], [0], [0], [1], [0, 0, 1, 1], [], []>} : vector<64x3xf32>, vector<3x8xf32>, vector<64x8xf32> -> vector<64x8xf32>
    %155 = arith.addf %151, %154 : vector<64x8xf32>
    %156 = vector.shape_cast %126 : vector<8x8x3xf32> to vector<64x3xf32>
    %157 = vector.extract_strided_slice %129 {offsets = [18, 0], sizes = [3, 8], strides = [1, 1]} : vector<27x8xf32> to vector<3x8xf32>
    %cst_51 = arith.constant dense<0.000000e+00> : vector<64x8xf32>
    %158 = tpu.matmul %156, %157, %cst_51 {dimension_numbers = #tpu.dot_dimension_numbers<[1], [0], [0], [1], [0, 0, 1, 1], [], []>} : vector<64x3xf32>, vector<3x8xf32>, vector<64x8xf32> -> vector<64x8xf32>
    %159 = arith.addf %155, %158 : vector<64x8xf32>
    %160 = vector.shape_cast %127 : vector<8x8x3xf32> to vector<64x3xf32>
    %161 = vector.extract_strided_slice %129 {offsets = [21, 0], sizes = [3, 8], strides = [1, 1]} : vector<27x8xf32> to vector<3x8xf32>
    %cst_52 = arith.constant dense<0.000000e+00> : vector<64x8xf32>
    %162 = tpu.matmul %160, %161, %cst_52 {dimension_numbers = #tpu.dot_dimension_numbers<[1], [0], [0], [1], [0, 0, 1, 1], [], []>} : vector<64x3xf32>, vector<3x8xf32>, vector<64x8xf32> -> vector<64x8xf32>
    %163 = arith.addf %159, %162 : vector<64x8xf32>
    %164 = vector.shape_cast %128 : vector<8x8x3xf32> to vector<64x3xf32>
    %165 = vector.extract_strided_slice %129 {offsets = [24, 0], sizes = [3, 8], strides = [1, 1]} : vector<27x8xf32> to vector<3x8xf32>
    %cst_53 = arith.constant dense<0.000000e+00> : vector<64x8xf32>
    %166 = tpu.matmul %164, %165, %cst_53 {dimension_numbers = #tpu.dot_dimension_numbers<[1], [0], [0], [1], [0, 0, 1, 1], [], []>} : vector<64x3xf32>, vector<3x8xf32>, vector<64x8xf32> -> vector<64x8xf32>
    %167 = arith.addf %163, %166 : vector<64x8xf32>
    %168 = vector.broadcast %130 : vector<1x8xf32> to vector<64x8xf32>
    %169 = arith.addf %167, %168 : vector<64x8xf32>
    %cst_54 = arith.constant 0.000000e+00 : f32
    %170 = vector.broadcast %cst_54 : f32 to vector<64x8xf32>
    %171 = arith.maximumf %169, %170 : vector<64x8xf32>
    %172 = vector.shape_cast %171 : vector<64x8xf32> to vector<8x8x8xf32>
    %cst_55 = arith.constant 0.000000e+00 : f32
    %173 = vector.broadcast %cst_55 : f32 to vector<8x8x8xf32>
    %174 = tpu.concatenate %172, %173 in 1 : vector<8x8x8xf32>, vector<8x8x8xf32> -> vector<8x16x8xf32>
    %cst_56 = arith.constant 0.000000e+00 : f32
    %175 = vector.broadcast %cst_56 : f32 to vector<1x16x8xf32>
    %176 = tpu.concatenate %174, %175 in 0 : vector<8x16x8xf32>, vector<1x16x8xf32> -> vector<9x16x8xf32>
    %177 = vector.extract_strided_slice %176 {offsets = [0, 0, 0], sizes = [8, 8, 8], strides = [1, 1, 1]} : vector<9x16x8xf32> to vector<8x8x8xf32>
    %178 = vector.extract_strided_slice %176 {offsets = [0, 1, 0], sizes = [8, 8, 8], strides = [1, 1, 1]} : vector<9x16x8xf32> to vector<8x8x8xf32>
    %179 = vector.extract_strided_slice %176 {offsets = [1, 0, 0], sizes = [8, 8, 8], strides = [1, 1, 1]} : vector<9x16x8xf32> to vector<8x8x8xf32>
    %180 = vector.extract_strided_slice %176 {offsets = [1, 1, 0], sizes = [8, 8, 8], strides = [1, 1, 1]} : vector<9x16x8xf32> to vector<8x8x8xf32>
    %c0_57 = arith.constant 0 : index
    %c0_58 = arith.constant 0 : index
    %181 = vector.load %arg8[%c0_57, %c0_58] : memref<32x12xf32, #tpu.memory_space<vmem>>, vector<32x12xf32>
    %c0_59 = arith.constant 0 : index
    %c0_60 = arith.constant 0 : index
    %182 = vector.load %arg9[%c0_59, %c0_60] : memref<1x12xf32, #tpu.memory_space<vmem>>, vector<1x12xf32>
    %cst_61 = arith.constant 0.000000e+00 : f32
    %183 = vector.broadcast %cst_61 : f32 to vector<64x12xf32>
    %184 = vector.shape_cast %177 : vector<8x8x8xf32> to vector<64x8xf32>
    %185 = vector.extract_strided_slice %181 {offsets = [0, 0], sizes = [8, 12], strides = [1, 1]} : vector<32x12xf32> to vector<8x12xf32>
    %cst_62 = arith.constant dense<0.000000e+00> : vector<64x12xf32>
    %186 = tpu.matmul %184, %185, %cst_62 {dimension_numbers = #tpu.dot_dimension_numbers<[1], [0], [0], [1], [0, 0, 1, 1], [], []>} : vector<64x8xf32>, vector<8x12xf32>, vector<64x12xf32> -> vector<64x12xf32>
    %187 = arith.addf %183, %186 : vector<64x12xf32>
    %188 = vector.shape_cast %178 : vector<8x8x8xf32> to vector<64x8xf32>
    %189 = vector.extract_strided_slice %181 {offsets = [8, 0], sizes = [8, 12], strides = [1, 1]} : vector<32x12xf32> to vector<8x12xf32>
    %cst_63 = arith.constant dense<0.000000e+00> : vector<64x12xf32>
    %190 = tpu.matmul %188, %189, %cst_63 {dimension_numbers = #tpu.dot_dimension_numbers<[1], [0], [0], [1], [0, 0, 1, 1], [], []>} : vector<64x8xf32>, vector<8x12xf32>, vector<64x12xf32> -> vector<64x12xf32>
    %191 = arith.addf %187, %190 : vector<64x12xf32>
    %192 = vector.shape_cast %179 : vector<8x8x8xf32> to vector<64x8xf32>
    %193 = vector.extract_strided_slice %181 {offsets = [16, 0], sizes = [8, 12], strides = [1, 1]} : vector<32x12xf32> to vector<8x12xf32>
    %cst_64 = arith.constant dense<0.000000e+00> : vector<64x12xf32>
    %194 = tpu.matmul %192, %193, %cst_64 {dimension_numbers = #tpu.dot_dimension_numbers<[1], [0], [0], [1], [0, 0, 1, 1], [], []>} : vector<64x8xf32>, vector<8x12xf32>, vector<64x12xf32> -> vector<64x12xf32>
    %195 = arith.addf %191, %194 : vector<64x12xf32>
    %196 = vector.shape_cast %180 : vector<8x8x8xf32> to vector<64x8xf32>
    %197 = vector.extract_strided_slice %181 {offsets = [24, 0], sizes = [8, 12], strides = [1, 1]} : vector<32x12xf32> to vector<8x12xf32>
    %cst_65 = arith.constant dense<0.000000e+00> : vector<64x12xf32>
    %198 = tpu.matmul %196, %197, %cst_65 {dimension_numbers = #tpu.dot_dimension_numbers<[1], [0], [0], [1], [0, 0, 1, 1], [], []>} : vector<64x8xf32>, vector<8x12xf32>, vector<64x12xf32> -> vector<64x12xf32>
    %199 = arith.addf %195, %198 : vector<64x12xf32>
    %200 = vector.broadcast %182 : vector<1x12xf32> to vector<64x12xf32>
    %201 = arith.addf %199, %200 : vector<64x12xf32>
    %cst_66 = arith.constant 0.000000e+00 : f32
    %202 = vector.broadcast %cst_66 : f32 to vector<64x12xf32>
    %203 = arith.maximumf %201, %202 : vector<64x12xf32>
    %204 = vector.shape_cast %203 : vector<64x12xf32> to vector<8x8x12xf32>
    %c0_67 = arith.constant 0 : index
    %c0_68 = arith.constant 0 : index
    %c0_69 = arith.constant 0 : index
    %c0_70 = arith.constant 0 : index
    %205 = vector.load %arg10[%c0_67, %c0_68, %c0_69, %c0_70] : memref<1x8x8x12xf32, #tpu.memory_space<vmem>>, vector<1x8x8x12xf32>
    %206 = vector.shape_cast %205 : vector<1x8x8x12xf32> to vector<8x8x12xf32>
    %207 = vector.shape_cast %204 : vector<8x8x12xf32> to vector<1x8x8x12xf32>
    tpu.vector_store %arg10[%c0_67, %c0_68, %c0_69, %c0_70], %207 {strides = array<i32>} : memref<1x8x8x12xf32, #tpu.memory_space<vmem>>, vector<1x8x8x12xf32>,
    return
  }
  func.func @transform_0(%arg0: i32) -> (i32, i32, i32, i32) {
    %c0_i32 = arith.constant 0 : i32
    %c0_i32_0 = arith.constant 0 : i32
    %c0_i32_1 = arith.constant 0 : i32
    %c0_i32_2 = arith.constant 0 : i32
    return %arg0, %c0_i32, %c0_i32_0, %c0_i32_1 : i32, i32, i32, i32
  }
  func.func @transform_1(%arg0: i32) -> (i32, i32) {
    %c0_i32 = arith.constant 0 : i32
    %c0_i32_0 = arith.constant 0 : i32
    %c0_i32_1 = arith.constant 0 : i32
    return %c0_i32, %c0_i32_0 : i32, i32
  }
  func.func @transform_2(%arg0: i32) -> (i32, i32) {
    %c0_i32 = arith.constant 0 : i32
    %c0_i32_0 = arith.constant 0 : i32
    %c0_i32_1 = arith.constant 0 : i32
    return %c0_i32, %c0_i32_0 : i32, i32
  }
  func.func @transform_3(%arg0: i32) -> (i32, i32) {
    %c0_i32 = arith.constant 0 : i32
    %c0_i32_0 = arith.constant 0 : i32
    %c0_i32_1 = arith.constant 0 : i32
    return %c0_i32, %c0_i32_0 : i32, i32
  }
  func.func @transform_4(%arg0: i32) -> (i32, i32) {
    %c0_i32 = arith.constant 0 : i32
    %c0_i32_0 = arith.constant 0 : i32
    %c0_i32_1 = arith.constant 0 : i32
    return %c0_i32, %c0_i32_0 : i32, i32
  }
  func.func @transform_5(%arg0: i32) -> (i32, i32) {
    %c0_i32 = arith.constant 0 : i32
    %c0_i32_0 = arith.constant 0 : i32
    %c0_i32_1 = arith.constant 0 : i32
    return %c0_i32, %c0_i32_0 : i32, i32
  }
  func.func @transform_6(%arg0: i32) -> (i32, i32) {
    %c0_i32 = arith.constant 0 : i32
    %c0_i32_0 = arith.constant 0 : i32
    %c0_i32_1 = arith.constant 0 : i32
    return %c0_i32, %c0_i32_0 : i32, i32
  }
  func.func @transform_7(%arg0: i32) -> (i32, i32) {
    %c0_i32 = arith.constant 0 : i32
    %c0_i32_0 = arith.constant 0 : i32
    %c0_i32_1 = arith.constant 0 : i32
    return %c0_i32, %c0_i32_0 : i32, i32
  }
  func.func @transform_8(%arg0: i32) -> (i32, i32) {
    %c0_i32 = arith.constant 0 : i32
    %c0_i32_0 = arith.constant 0 : i32
    %c0_i32_1 = arith.constant 0 : i32
    return %c0_i32, %c0_i32_0 : i32, i32
  }
  func.func @transform_9(%arg0: i32) -> (i32, i32, i32, i32) {
    %c0_i32 = arith.constant 0 : i32
    %c0_i32_0 = arith.constant 0 : i32
    %c0_i32_1 = arith.constant 0 : i32
    %c0_i32_2 = arith.constant 0 : i32
    return %arg0, %c0_i32, %c0_i32_0, %c0_i32_1 : i32, i32, i32, i32
  }
}

</mosaic_0001>

<bundles_post_ra>
// kernel: tile.8
= control target key start
LH: loop header
LB: loop body
LE: loop exit
PB: predicated region body
PF: predicated region fallthrough
CT: control target
= control target key end

     0   :  { %s22_s0 = inlined_call_operand.vmem [shape: f32[3], index: 0, kind: input, shape index: {}]   ;;  %s23_s1 = inlined_call_operand.vmem [shape: f32[4,3], index: 1, kind: output, shape index: {}]  }
   0x1   :  { %v4_v0 = vld [vmem:[%s22_s0] ss:$0 sm:$0xff] }
   0x2   :  { %5 = vst [vmem:[%s23_s1] sm:$0xf] %v4_v0 }

// kernel: tile.9
= control target key start
LH: loop header
LB: loop body
LE: loop exit
PB: predicated region body
PF: predicated region fallthrough
CT: control target
= control target key end

     0   :  { %s37_s8 = smov 3   ;;  %s38_s9 = smov 6   ;;  %vm7_vm0 = vcmask 23552   ;;  %vm13_vm1 = vcmask 97352   ;;  %vm19_vm2 = vcmask 72752   ;;  %vm25_vm3 = vcmask 48152   ;;  %s55_s0 = inlined_call_operand.vmem [shape: f32[4,3], index: 0, kind: input, shape index: {}]   ;;  %s56_s1 = inlined_call_operand.vmem [shape: f32[1,12], index: 1, kind: output, shape index: {}]  }
   0x1   :  { %v4_v0 = vld [vmem:[%s55_s0] sm:$0xf]  ;;  %s36_s0 = smov 9  }
   0x2   :  { %5 = vst [vmem:[#allocation1] sm:$0xf] %v4_v0 }
   0x9   :  { %v10_v1 = vld [vmem:[#allocation1 + $0x3] sm:$0x1]   ;;  %v22_v2 = vld [vmem:[#allocation1 + $0x1] sm:$0x1]   ;;  %v16_v3 = vld [vmem:[#allocation1 + $0x2] sm:$0x1]  }
   0xa   :  { %11 = vrot.lane.b32.xlu0 %v10_v1, %s36_s0  ;;  %23 = vrot.lane.b32.xlu1 %v22_v2, %s37_s8  ;;  %v6_v4 = vld [vmem:[#allocation1] sm:$0x1]  }
   0xb   :  { %8 = vst.msk [vmem:[#allocation0] sm:$0x1] %vm7_vm0, %v6_v4  }
  0x12   :  { %17 = vrot.lane.b32.xlu0 %v16_v3, %s38_s9 }
  0x7c   :  { %v12_v5 = vpop.permute.xlu0 %11   ;;  %v24_v6 = vpop.permute.xlu1 %23  }
  0x7d   :  { %14 = vst.msk [vmem:[#allocation0] sm:$0x1] %vm13_vm1, %v12_v5  }
  0x84   :  { %v18_v7 = vpop.permute.xlu0 %17  }
  0x85   :  { %20 = vst.msk [vmem:[#allocation0] sm:$0x1] %vm19_vm2, %v18_v7  }
  0x86   :  { %26 = vst.msk [vmem:[#allocation0] sm:$0x1] %vm25_vm3, %v24_v6  }
  0x8d   :  { %v29_v8 = vld [vmem:[#allocation0] sm:$0x1] }
  0x8e   :  { %32 = vst [vmem:[%s56_s1] sm:$0x1] %v29_v8 }

// kernel: autoencoder_forward.1
= control target key start
LH: loop header
LB: loop body
LE: loop exit
PB: predicated region body
PF: predicated region fallthrough
CT: control target
= control target key end

     0   :  { %s2859_s30 = smov 0   ;;  %s3960_s0 = inlined_call_operand.vmem [shape: f32[2,9,9,12], index: 0, kind: input, shape index: {}]   ;;  %s3961_s1 = inlined_call_operand.vmem [shape: f32[27,8], index: 1, kind: input, shape index: {}]   ;;  %s3962_s2 = inlined_call_operand.vmem [shape: f32[1,8], index: 2, kind: input, shape index: {}]   ;;  %s3963_s3 = inlined_call_operand.vmem [shape: f32[72,3], index: 3, kind: input, shape index: {}]   ;;  %s3964_s4 = inlined_call_operand.vmem [shape: f32[1,3], index: 4, kind: input, shape index: {}]   ;;  %s3965_s5 = inlined_call_operand.vmem [shape: f32[27,8], index: 5, kind: input, shape index: {}]   ;;  %s3966_s6 = inlined_call_operand.vmem [shape: f32[1,8], index: 6, kind: input, shape index: {}]   ;;  %s3967_s7 = inlined_call_operand.vmem [shape: f32[32,12], index: 7, kind: input, shape index: {}]   ;;  %s3968_s8 = inlined_call_operand.vmem [shape: f32[1,12], index: 8, kind: input, shape index: {}]   ;;  %s3969_s9 = inlined_call_operand.vmem [shape: f32[2,8,8,12], index: 9, kind: output, shape index: {}]  }
   0x1 LB: > { %s2505_s10 = sadd.s32 4294967295, %s2803_s30   ;;  %p2509_p0 = scmp.ge.s32.totalorder %s2803_s30, 1  ;;  %s2803_s30 = sphi %s2859_s30, %s19_s30  }
   0x2   : > { %p287_p1 = scmp.lt.s32.totalorder %s2803_s30, 3 }
   0x4   : > { %p288_p2 = pnand %p2509_p0, %p287_p1 }
   0x5   : > { %p323_p3 = scmp.lt.s32.totalorder (!%p288_p2), %s2505_s10, 1  ;;  %s2805_s15 = smov (!%p288_p2), 125  }
   0x6   : > { %291 = sbr.rel (%p288_p2) target bundleno = 1099 (0x44b), region = 56  ;;  %s2806_s16 = smov (!%p288_p2), 122  }
   0x7   : > { %s2807_s17 = smov (!%p288_p2), 119  }
   0xb   : > { %s3971_s10 = smov (!%p323_p3, %s2505_s10), 1  ;;  %v351_v8 = vld [vmem:[%s3961_s1] sm:$0xff]  ;;  %vm399_vm0 = vcmask 1042432   ;;  %vm510_vm1 = vcmask 1046528   ;;  %vm382_vm2 = vcmask 23552   ;;  %v2988_v34 = vld [vmem:[%s3961_s1 + $0x8] sm:$0xff] }
   0xc   : > { %s2780_s11 = smul.u32 144, %s3971_s10  ;;  %v381_v9 = vrot.slane %v351_v8, 3  ;;  %2522 = vmatpush.msk.msra.mxu1 %vm399_vm0, %v351_v8  ;;  %vm536_vm3 = vcmask 1041408   ;;  %v537_v35 = vrot.slane %v351_v8, 6  ;;  %v538_v36 = vrot.slane %v2988_v34, 6  ;;  %v353_v58 = vld [vmem:[%s3961_s1 + $0x10] sm:$0xff] }
   0xd   : > { %v707_v38 = vrot.slane %v2988_v34, 4  ;;  %v623_v53 = vrot.slane %v2988_v34, 1  ;;  %v354_v61 = vld [vmem:[%s3961_s1 + $0x18] sm:$0x7]  ;;  %v863_v62 = vrot.slane %v353_v58, 2  ;;  %vm792_vm4 = vcmask 1040384  }
   0xe   : > { %s2873_s14 = scalar_lea.vmem %s3960_s0, %s2780_s11  ;;  %2777 = vmatpush.msk.msra.mxu3 %vm399_vm0, %v381_v9  ;;  %2513 = vmatpush.msk.msra.mxu0 %vm399_vm0, %v381_v9  ;;  %v539_v37 = vsel %vm536_vm3, %v537_v35, %v538_v36  ;;  %v793_v63 = vrot.slane %v2988_v34, 7  ;;  %vm1085_vm5 = vcmask 64512   ;;  %s2776_s11 = sshll.u32 %s3971_s10, 6  ;;  %vm2441_vm6 = vcmask 97280  }
   0xf   : > { %v2876_v0 = vld [vmem:[%s2873_s14 + $0x60] sm:$0xff]  ;;  %v2879_v1 = vld [vmem:[%s2873_s14 + $0x70] sm:$0xff]  ;;  %v334_v10 = vld [vmem:[%s2873_s14 + $0x8] sm:$0x1]  ;;  %2531 = vmatpush.msk.msra.mxu2 %vm399_vm0, %v539_v37 }
  0x10   : > { %376 = vrot.lane.b32.xlu0 %v2876_v0, %s2805_s15  ;;  %378 = vrot.lane.b32.xlu1 %v2879_v1, %s2805_s15  ;;  %v2886_v2 = vld [vmem:[%s2873_s14 + $0x20] sm:$0xff]  ;;  %v2894_v4 = vld [vmem:[%s2873_s14 + $0x10] sm:$0xff]  ;;  %v512_v14 = vrot.slane %v334_v10, 1  ;;  %v529_v31 = vrot.slane %v2876_v0, 1  ;;  %v532_v44 = vrot.slane %v2879_v1, 1  ;;  %v920_v10 = vrot.slane %v353_v58, 5 }
  0x11   : > { %368 = vrot.lane.b32.xlu2 %v2886_v2, %s2805_s15  ;;  %v2891_v3 = vld [vmem:[%s2873_s14] sm:$0xff]  ;;  %v2901_v5 = vld [vmem:[%s2873_s14 + $0x30] sm:$0xff]  ;;  %2778 = vmatpush.msk.msrb.mxu3 %vm399_vm0, %v351_v8  ;;  %v336_v11 = vld [vmem:[%s2873_s14 + $0x18] sm:$0x1]  ;;  %v514_v15 = vrot.slane %v2894_v4, 1  ;;  %v517_v17 = vrot.slane %v2886_v2, 1 }
  0x12   : > { %v2906_v6 = vld [vmem:[%s2873_s14 + $0x40] sm:$0xff]  ;;  %v2909_v7 = vld [vmem:[%s2873_s14 + $0x50] sm:$0xff]  ;;  %v338_v12 = vld [vmem:[%s2873_s14 + $0x28] sm:$0x1]  ;;  %v511_v13 = vrot.slane %v2891_v3, 1  ;;  %v515_v16 = vrot.slane %v336_v11, 1  ;;  %2523 = vmatmul.msk.f32.vlgmr.msra.gmra.mxu1 %vm382_vm2, %v2891_v3  ;;  %2549 = vmatpush.msk.msrb.mxu0 %vm399_vm0, %v707_v38 }
  0x13   : > { %v518_v18 = vrot.slane %v338_v12, 1  ;;  %v340_v21 = vld [vmem:[%s2873_s14 + $0x38] sm:$0x1]  ;;  %v342_v22 = vld [vmem:[%s2873_s14 + $0x48] sm:$0x1]  ;;  %v520_v24 = vrot.slane %v2901_v5, 1  ;;  %2567 = vmatpush.msk.msrb.mxu2 %vm399_vm0, %v863_v62 }
  0x14   : > { %v513_v19 = vsel %vm510_vm1, %v511_v13, %v512_v14  ;;  %v2954_v20 = vsel %vm510_vm1, %v514_v15, %v515_v16  ;;  %v521_v25 = vrot.slane %v340_v21, 1  ;;  %v523_v26 = vrot.slane %v2906_v6, 1  ;;  %v346_v30 = vld [vmem:[%s2873_s14 + $0x68] sm:$0x1]  ;;  %v344_v39 = vld [vmem:[%s2873_s14 + $0x58] sm:$0x1] }
  0x15   : > { %v2959_v23 = vsel %vm510_vm1, %v517_v17, %v518_v18  ;;  %v524_v27 = vrot.slane %v342_v22, 1  ;;  %v530_v32 = vrot.slane %v346_v30, 1  ;;  %2532 = vmatmul.msk.f32.vlgmr.msra.gmra.mxu2 %vm382_vm2, %v513_v19  ;;  %v526_v40 = vrot.slane %v2909_v7, 1  ;;  %v348_v43 = vld [vmem:[%s2873_s14 + $0x78] sm:$0x1]  ;;  %v3058_v56 = vld [vmem:[%s2873_s14 + $0x80] sm:$0xff] }
  0x16   : > { %v2969_v28 = vsel %vm510_vm1, %v520_v24, %v521_v25  ;;  %v527_v41 = vrot.slane %v344_v39, 1  ;;  %v533_v45 = vrot.slane %v348_v43, 1  ;;  %v350_v38 = vld [vmem:[%s2873_s14 + $0x88] sm:$0x1]  ;;  %s3932_s14 = scalar_lea.vmem %s3969_s9, %s2776_s11 }
  0x17   : > { %v2972_v29 = vsel %vm510_vm1, %v523_v26, %v524_v27  ;;  %v2981_v33 = vsel %vm510_vm1, %v529_v31, %v530_v32  ;;  %v1052_v31 = vld [vmem:[%s3963_s3 + $0x8] sm:$0xff] }
  0x18   : > { %364 = vrot.lane.b32.xlu0 %v2891_v3, %s2805_s15  ;;  %366 = vrot.lane.b32.xlu1 %v2894_v4, %s2805_s15  ;;  %v3003_v42 = vsel %vm510_vm1, %v526_v40, %v527_v41  ;;  %v3018_v46 = vsel %vm510_vm1, %v532_v44, %v533_v45  ;;  %v975_v40 = vrot.slane %v3058_v56, 1  ;;  %v976_v41 = vrot.slane %v350_v38, 1 }
  0x19   : > { %370 = vrot.lane.b32.xlu2 %v2901_v5, %s2805_s15 }
  0x1a   : > { %2524 = vmatmul.msk.f32.gmra.mxu1 %vm382_vm2, %v2894_v4  ;;  %v977_v44 = vsel %vm510_vm1, %v975_v40, %v976_v41 }
  0x1d   : > { %2533 = vmatmul.msk.f32.gmra.mxu2 %vm382_vm2, %v2954_v20 }
  0x20   : > { %372 = vrot.lane.b32.xlu0 %v2906_v6, %s2805_s15  ;;  %374 = vrot.lane.b32.xlu1 %v2909_v7, %s2805_s15 }
  0x21   : > { %607 = vrot.lane.b32.xlu2 %v2891_v3, %s2806_s16 }
  0x22   : > { %2525 = vmatmul.msk.f32.gmra.mxu1 %vm382_vm2, %v2886_v2 }
  0x25   : > { %2534 = vmatmul.msk.f32.gmra.mxu2 %vm382_vm2, %v2959_v23 }
  0x28   : > { %609 = vrot.lane.b32.xlu0 %v2894_v4, %s2806_s16  ;;  %691 = vrot.lane.b32.xlu1 %v2891_v3, %s2807_s17  ;;  %v794_v3 = vrot.slane %v353_v58, 7 }
  0x29   : > { %611 = vrot.lane.b32.xlu2 %v2886_v2, %s2806_s16 }
  0x2a   : > { %2526 = vmatmul.msk.f32.gmra.mxu1 %vm382_vm2, %v2901_v5  ;;  %v795_v8 = vsel %vm792_vm4, %v793_v63, %v794_v3 }
  0x2b   : > { %2558 = vmatpush.msk.msrb.mxu1 %vm399_vm0, %v795_v8  ;;  %v1054_v8 = vld [vmem:[%s3963_s3 + $0x18] sm:$0xff] }
  0x2d   : > { %2535 = vmatmul.msk.f32.gmra.mxu2 %vm382_vm2, %v2969_v28  ;;  %1117 = vmatpush.msra.mxu1 %v1052_v31 }
  0x30   : > { %693 = vrot.lane.b32.xlu0 %v2894_v4, %s2807_s17  ;;  %613 = vrot.lane.b32.xlu1 %v2901_v5, %s2806_s16 }
  0x31   : > { %695 = vrot.lane.b32.xlu2 %v2886_v2, %s2807_s17 }
  0x32   : > { %2527 = vmatmul.msk.f32.gmra.mxu1 %vm382_vm2, %v2906_v6 }
  0x35   : > { %2536 = vmatmul.msk.f32.gmra.mxu2 %vm382_vm2, %v2972_v29 }
  0x38   : > { %615 = vrot.lane.b32.xlu0 %v2906_v6, %s2806_s16  ;;  %697 = vrot.lane.b32.xlu1 %v2901_v5, %s2807_s17 }
  0x39   : > { %617 = vrot.lane.b32.xlu2 %v2909_v7, %s2806_s16 }
  0x3a   : > { %2528 = vmatmul.msk.f32.gmra.mxu1 %vm382_vm2, %v2909_v7 }
  0x3d   : > { %2537 = vmatmul.msk.f32.gmra.mxu2 %vm382_vm2, %v3003_v42 }
  0x40   : > { %699 = vrot.lane.b32.xlu0 %v2906_v6, %s2807_s17  ;;  %619 = vrot.lane.b32.xlu1 %v2876_v0, %s2806_s16 }
  0x41   : > { %701 = vrot.lane.b32.xlu2 %v2909_v7, %s2807_s17 }
  0x45   : > { %2568 = vmatmul.msk.f32.vlgmr.msrb.gmra.mxu2 %vm382_vm2, %v2894_v4 }
  0x48   : > { %621 = vrot.lane.b32.xlu0 %v2879_v1, %s2806_s16  ;;  %703 = vrot.lane.b32.xlu1 %v2876_v0, %s2807_s17 }
  0x49   : > { %705 = vrot.lane.b32.xlu2 %v2879_v1, %s2807_s17 }
  0x4d   : > { %2569 = vmatmul.msk.f32.gmra.mxu2 %vm382_vm2, %v2886_v2 }
  0x50   : > { %775 = vrot.lane.b32.xlu0 %v513_v19, %s2806_s16  ;;  %777 = vrot.lane.b32.xlu1 %v2954_v20, %s2806_s16 }
  0x51   : > { %779 = vrot.lane.b32.xlu2 %v2959_v23, %s2806_s16 }
  0x55   : > { %2570 = vmatmul.msk.f32.gmra.mxu2 %vm382_vm2, %v2901_v5 }
  0x58   : > { %781 = vrot.lane.b32.xlu0 %v2969_v28, %s2806_s16  ;;  %783 = vrot.lane.b32.xlu1 %v2972_v29, %s2806_s16 }
  0x59   : > { %785 = vrot.lane.b32.xlu2 %v3003_v42, %s2806_s16 }
  0x5d   : > { %2571 = vmatmul.msk.f32.gmra.mxu2 %vm382_vm2, %v2906_v6 }
  0x60   : > { %787 = vrot.lane.b32.xlu0 %v2981_v33, %s2806_s16  ;;  %918 = vrot.lane.b32.xlu1 %v3058_v56, %s2805_s15 }
  0x61   : > { %789 = vrot.lane.b32.xlu2 %v3018_v46, %s2806_s16 }
  0x65   : > { %2572 = vmatmul.msk.f32.gmra.mxu2 %vm382_vm2, %v2909_v7 }
  0x6b   : > { %v3024_v47 = vpop.permute.xlu2 %368 }
  0x6d   : > { %2573 = vmatmul.msk.f32.gmra.mxu2 %vm382_vm2, %v2876_v0 }
  0x73   : > { %v3042_v52 = vpop.permute.xlu2 %370 }
  0x75   : > { %2574 = vmatmul.msk.f32.gmra.mxu2 %vm382_vm2, %v2879_v1 }
  0x7b   : > { %v608_v57 = vpop.permute.xlu2 %607 }
  0x7d   : > { %2575 = vmatmul.msk.f32.gmra.mxu2 %vm382_vm2, %v3058_v56  ;;  %v1051_v56 = vld [vmem:[%s3963_s3] sm:$0xff] }
  0x7e   : > { %1174 = vmatpush.msra.mxu2 %v1051_v56 }
  0x82   : > { %v3026_v48 = vpop.permute.xlu0 %376  ;;  %v3028_v49 = vpop.permute.xlu1 %378 }
  0x83   : > { %2520 = vmatmul.msk.f32.vlgmr.msra.gmra.mxu3 %vm382_vm2, %v3026_v48  ;;  %v612_v9 = vpop.permute.xlu2 %611 }
  0x84   : > { %2779 = vmatpush.msk.msra.mxu3 %vm399_vm0, %v539_v37 }
  0x8a   : > { %v365_v50 = vpop.permute.xlu0 %364  ;;  %v3037_v51 = vpop.permute.xlu1 %366 }
  0x8b   : > { %2514 = vmatmul.msk.f32.vlgmr.msra.gmra.mxu0 %vm382_vm2, %v365_v50  ;;  %2521 = vmatmul.msk.f32.gmra.mxu3 %vm382_vm2, %v3028_v49  ;;  %v696_v13 = vpop.permute.xlu2 %695 }
  0x8c   : > { %2585 = vmatpush.msk.msra.mxu0 %vm399_vm0, %v354_v61  ;;  %v2808_v61 = vmov 0.0  }
  0x8d   : > { %v3204_v62 = vrot.slane %v2808_v61, 7  ;;  %v3212_v3 = vrot.slane %v2808_v61, 1 }
  0x8f   : > { %2601 = vmatmul.msk.f32.vlgmr.msra.gmra.mxu2 %vm1085_vm5, %v3204_v62 }
  0x92   : > { %v3049_v54 = vpop.permute.xlu0 %372  ;;  %v3051_v55 = vpop.permute.xlu1 %374 }
  0x93   : > { %2515 = vmatmul.msk.f32.gmra.mxu0 %vm382_vm2, %v3037_v51  ;;  %2529 = vmatmul.msk.f32.vlgmr.msrb.gmra.mxu3 %vm382_vm2, %v2876_v0  ;;  %v618_v16 = vpop.permute.xlu2 %617 }
  0x94   : > { %2540 = vmatpush.msk.msrb.mxu3 %vm399_vm0, %v623_v53 }
  0x98   : > { %v575_v39 = vpop.f32.mrf.mxu2 }
  0x9a   : > { %v610_v59 = vpop.permute.xlu0 %609  ;;  %v692_v60 = vpop.permute.xlu1 %691 }
  0x9b   : > { %2516 = vmatmul.msk.f32.gmra.mxu0 %vm382_vm2, %v3024_v47  ;;  %2530 = vmatmul.msk.f32.gmra.mxu3 %vm382_vm2, %v2879_v1  ;;  %v702_v18 = vpop.permute.xlu2 %701 }
  0xa0   : > { %v578_v45 = vpop.f32.mrf.mxu2 }
  0xa2   : > { %v694_v11 = vpop.permute.xlu0 %693  ;;  %v614_v12 = vpop.permute.xlu1 %613 }
  0xa3   : > { %2517 = vmatmul.msk.f32.gmra.mxu0 %vm382_vm2, %v3042_v52  ;;  %2538 = vmatmul.msk.f32.vlgmr.msra.gmra.mxu3 %vm382_vm2, %v2981_v33  ;;  %v706_v6 = vpop.permute.xlu2 %705 }
  0xa4   : > { %2576 = vmatpush.msk.msra.mxu3 %vm399_vm0, %v920_v10  ;;  %v1055_v10 = vld [vmem:[%s3963_s3 + $0x20] sm:$0xff] }
  0xa8   : > { %v581_v50 = vpop.f32.mrf.mxu2 }
  0xaa   : > { %v616_v14 = vpop.permute.xlu0 %615  ;;  %v698_v4 = vpop.permute.xlu1 %697 }
  0xab   : > { %2518 = vmatmul.msk.f32.gmra.mxu0 %vm382_vm2, %v3049_v54  ;;  %2539 = vmatmul.msk.f32.gmra.mxu3 %vm382_vm2, %v3018_v46  ;;  %v780_v7 = vpop.permute.xlu2 %779 }
  0xb2   : > { %v700_v15 = vpop.permute.xlu0 %699  ;;  %v620_v2 = vpop.permute.xlu1 %619 }
  0xb3   : > { %2519 = vmatmul.msk.f32.gmra.mxu0 %vm382_vm2, %v3051_v55  ;;  %2541 = vmatmul.msk.f32.vlgmr.msrb.gmra.mxu3 %vm382_vm2, %v608_v57  ;;  %v786_v1 = vpop.permute.xlu2 %785  ;;  %v1053_v57 = vld [vmem:[%s3963_s3 + $0x10] sm:$0xff] }
  0xb4   : > { %1247 = vmatpush.msrb.mxu3 %v1053_v57 }
  0xba   : > { %v622_v17 = vpop.permute.xlu0 %621  ;;  %v704_v5 = vpop.permute.xlu1 %703 }
  0xbb   : > { %2542 = vmatmul.msk.f32.gmra.mxu3 %vm382_vm2, %v610_v59  ;;  %2550 = vmatmul.msk.f32.vlgmr.msrb.gmra.mxu0 %vm382_vm2, %v692_v60  ;;  %v790_v25 = vpop.permute.xlu2 %789 }
  0xbc   : > { %1301 = vmatpush.msrb.mxu0 %v1054_v8 }
  0xc2   : > { %v776_v19 = vpop.permute.xlu0 %775  ;;  %v778_v21 = vpop.permute.xlu1 %777 }
  0xc3   : > { %2543 = vmatmul.msk.f32.gmra.mxu3 %vm382_vm2, %v612_v9  ;;  %2551 = vmatmul.msk.f32.gmra.mxu0 %vm382_vm2, %v694_v11 }
  0xc4   : > { %2559 = vmatmul.msk.f32.vlgmr.msrb.gmra.mxu1 %vm382_vm2, %v776_v19 }
  0xc5   : > { %1352 = vmatpush.msrb.mxu1 %v1055_v10 }
  0xca   : > { %v782_v0 = vpop.permute.xlu0 %781  ;;  %v784_v22 = vpop.permute.xlu1 %783 }
  0xcb   : > { %2544 = vmatmul.msk.f32.gmra.mxu3 %vm382_vm2, %v614_v12  ;;  %2552 = vmatmul.msk.f32.gmra.mxu0 %vm382_vm2, %v696_v13 }
  0xcc   : > { %2560 = vmatmul.msk.f32.gmra.mxu1 %vm382_vm2, %v778_v21 }
  0xd2   : > { %v788_v24 = vpop.permute.xlu0 %787  ;;  %v919_v37 = vpop.permute.xlu1 %918 }
  0xd3   : > { %2545 = vmatmul.msk.f32.gmra.mxu3 %vm382_vm2, %v616_v14  ;;  %2553 = vmatmul.msk.f32.gmra.mxu0 %vm382_vm2, %v698_v4 }
  0xd4   : > { %2561 = vmatmul.msk.f32.gmra.mxu1 %vm382_vm2, %v780_v7 }
  0xdb   : > { %2546 = vmatmul.msk.f32.gmra.mxu3 %vm382_vm2, %v618_v16  ;;  %2554 = vmatmul.msk.f32.gmra.mxu0 %vm382_vm2, %v700_v15 }
  0xdc   : > { %2562 = vmatmul.msk.f32.gmra.mxu1 %vm382_vm2, %v782_v0 }
  0xe3   : > { %2547 = vmatmul.msk.f32.gmra.mxu3 %vm382_vm2, %v620_v2  ;;  %2555 = vmatmul.msk.f32.gmra.mxu0 %vm382_vm2, %v702_v18 }
  0xe4   : > { %2563 = vmatmul.msk.f32.gmra.mxu1 %vm382_vm2, %v784_v22 }
  0xeb   : > { %2548 = vmatmul.msk.f32.gmra.mxu3 %vm382_vm2, %v622_v17  ;;  %2556 = vmatmul.msk.f32.gmra.mxu0 %vm382_vm2, %v704_v5 }
  0xec   : > { %2564 = vmatmul.msk.f32.gmra.mxu1 %vm382_vm2, %v786_v1 }
  0xf3   : > { %2557 = vmatmul.msk.f32.gmra.mxu0 %vm382_vm2, %v706_v6  ;;  %2577 = vmatmul.msk.f32.vlgmr.msra.gmra.mxu3 %vm382_vm2, %v3037_v51 }
  0xf4   : > { %2565 = vmatmul.msk.f32.gmra.mxu1 %vm382_vm2, %v788_v24 }
  0xfb   : > { %2578 = vmatmul.msk.f32.gmra.mxu3 %vm382_vm2, %v3024_v47  ;;  %2586 = vmatmul.msk.f32.vlgmr.msra.gmra.mxu0 %vm382_vm2, %v2954_v20 }
  0xfc   : > { %2566 = vmatmul.msk.f32.gmra.mxu1 %vm382_vm2, %v790_v25 }
 0x103   : > { %2579 = vmatmul.msk.f32.gmra.mxu3 %vm382_vm2, %v3042_v52  ;;  %2587 = vmatmul.msk.f32.gmra.mxu0 %vm382_vm2, %v2959_v23 }
 0x104   : > { %1118 = vmatmul.f32.vlgmr.msra.gmra.mxu1 %v2808_v61 }
 0x106   : > { %v3139_v26 = vpop.f32.mrf.mxu3 }
 0x108   : > { %v3141_v27 = vpop.f32.mrf.mxu0 }
 0x10b   : > { %2580 = vmatmul.msk.f32.gmra.mxu3 %vm382_vm2, %v3049_v54  ;;  %2588 = vmatmul.msk.f32.gmra.mxu0 %vm382_vm2, %v2969_v28  ;;  %v3189_v54 = vpop.f32.mrf.mxu2 }
 0x10e   : > { %v3147_v30 = vpop.f32.mrf.mxu3 }
 0x110   : > { %v3149_v20 = vpop.f32.mrf.mxu0 }
 0x113   : > { %2581 = vmatmul.msk.f32.gmra.mxu3 %vm382_vm2, %v3051_v55  ;;  %2589 = vmatmul.msk.f32.gmra.mxu0 %vm382_vm2, %v2972_v29  ;;  %v478_v29 = vpop.f32.mrf.mxu1  ;;  %v3207_v63 = vpop.f32.mrf.mxu2 }
 0x114   : > { %v479_v2 = vadd.f32 %v478_v29, %v3141_v27 }
 0x116   : > { %v3155_v23 = vpop.f32.mrf.mxu3  ;;  %v599_v5 = vadd.f32 %v575_v39, %v479_v2 }
 0x118   : > { %v3160_v32 = vpop.f32.mrf.mxu0 }
 0x11b   : > { %2582 = vmatmul.msk.f32.gmra.mxu3 %vm382_vm2, %v3026_v48  ;;  %2590 = vmatmul.msk.f32.gmra.mxu0 %vm382_vm2, %v3003_v42  ;;  %v481_v43 = vpop.f32.mrf.mxu1  ;;  %v3228_v13 = vpop.f32.mrf.mxu2 }
 0x11c   : > { %v482_v21 = vadd.f32 %v481_v43, %v3149_v20  ;;  %v3248_v20 = vld [vmem:[%s3962_s2] ss:$0 sm:$0xff] }
 0x11e   : > { %v3166_v28 = vpop.f32.mrf.mxu3  ;;  %v600_v24 = vadd.f32 %v578_v45, %v482_v21 }
 0x120   : > { %v3168_v34 = vpop.f32.mrf.mxu0 }
 0x123   : > { %2583 = vmatmul.msk.f32.gmra.mxu3 %vm382_vm2, %v3028_v49  ;;  %2591 = vmatmul.msk.f32.gmra.mxu0 %vm382_vm2, %v2981_v33  ;;  %v484_v49 = vpop.f32.mrf.mxu1  ;;  %v886_v16 = vpop.f32.mrf.mxu2 }
 0x124   : > { %v485_v27 = vadd.f32 %v484_v49, %v3160_v32 }
 0x126   : > { %v3174_v35 = vpop.f32.mrf.mxu3 }
 0x128   : > { %v3176_v36 = vpop.f32.mrf.mxu0 }
 0x12b   : > { %2584 = vmatmul.msk.f32.gmra.mxu3 %vm382_vm2, %v919_v37  ;;  %2592 = vmatmul.msk.f32.gmra.mxu0 %vm382_vm2, %v3018_v46  ;;  %v487_v46 = vpop.f32.mrf.mxu1  ;;  %v889_v7 = vpop.f32.mrf.mxu2 }
 0x12c   : > { %v488_v56 = vadd.f32 %v487_v46, %v3168_v34 }
 0x12e   : > { %v3183_v42 = vpop.f32.mrf.mxu3 }
 0x130   : > { %v3185_v33 = vpop.f32.mrf.mxu0 }
 0x133   : > { %2593 = vmatmul.msk.f32.gmra.mxu0 %vm382_vm2, %v977_v44  ;;  %v3197_v58 = vpop.f32.mrf.mxu1  ;;  %2609 = vmatmul.msk.f32.vlgmr.msrb.gmra.mxu3 %vm1085_vm5, %v3212_v3  ;;  %v892_v41 = vpop.f32.mrf.mxu2  ;;  %v601_v44 = vadd.f32 %v581_v50, %v485_v27 }
 0x136   : > { %v659_v47 = vpop.f32.mrf.mxu3 }
 0x137   : > { %v683_v6 = vadd.f32 %v659_v47, %v599_v5 }
 0x138   : > { %v743_v48 = vpop.f32.mrf.mxu0 }
 0x139   : > { %v767_v22 = vadd.f32 %v743_v48, %v683_v6  ;;  %v491_v6 = vadd.f32 %v3197_v58, %v3176_v36 }
 0x13b   : > { %v3224_v11 = vpop.f32.mrf.mxu1 }
 0x13e   : > { %v662_v51 = vpop.f32.mrf.mxu3 }
 0x13f   : > { %v684_v31 = vadd.f32 %v662_v51, %v600_v24 }
 0x140   : > { %v746_v52 = vpop.f32.mrf.mxu0 }
 0x141   : > { %v768_v40 = vadd.f32 %v746_v52, %v684_v31 }
 0x143   : > { %v831_v4 = vpop.f32.mrf.mxu1 }
 0x144   : > { %v855_v25 = vadd.f32 %v831_v4, %v767_v22 }
 0x146   : > { %v665_v53 = vpop.f32.mrf.mxu3  ;;  %v910_v29 = vadd.f32 %v886_v16, %v855_v25 }
 0x147   : > { %v685_v45 = vadd.f32 %v665_v53, %v601_v44  ;;  %v602_v53 = vadd.f32 %v3189_v54, %v488_v56 }
 0x148   : > { %v749_v55 = vpop.f32.mrf.mxu0 }
 0x149   : > { %v769_v8 = vadd.f32 %v749_v55, %v685_v45  ;;  %v895_v55 = vpop.f32.mrf.mxu2 }
 0x14b   : > { %v834_v19 = vpop.f32.mrf.mxu1 }
 0x14c   : > { %v856_v47 = vadd.f32 %v834_v19, %v768_v40 }
 0x14e   : > { %v3199_v59 = vpop.f32.mrf.mxu3  ;;  %v911_v32 = vadd.f32 %v889_v7, %v856_v47 }
 0x14f   : > { %v686_v19 = vadd.f32 %v3199_v59, %v602_v53 }
 0x150   : > { %v3201_v60 = vpop.f32.mrf.mxu0 }
 0x151   : > { %v770_v24 = vadd.f32 %v3201_v60, %v686_v19  ;;  %v1058_v19 = vld [vmem:[%s3963_s3 + $0x38] sm:$0xff] }
 0x152   : > { %1503 = vmatpush.msra.mxu0 %v1058_v19 }
 0x153   : > { %v837_v37 = vpop.f32.mrf.mxu1 }
 0x154   : > { %v857_v2 = vadd.f32 %v837_v37, %v769_v8  ;;  %v603_v37 = vadd.f32 %v3207_v63, %v491_v6 }
 0x156   : > { %v3219_v9 = vpop.f32.mrf.mxu3  ;;  %v912_v21 = vadd.f32 %v892_v41, %v857_v2  ;;  %v898_v41 = vpop.f32.mrf.mxu2 }
 0x157   : > { %v687_v63 = vadd.f32 %v3219_v9, %v603_v37  ;;  %v1056_v9 = vld [vmem:[%s3963_s3 + $0x28] sm:$0xff] }
 0x158   : > { %v3226_v12 = vpop.f32.mrf.mxu0  ;;  %1405 = vmatpush.msrb.mxu2 %v1056_v9 }
 0x159   : > { %v771_v45 = vadd.f32 %v3226_v12, %v687_v63 }
 0x15b   : > { %v840_v52 = vpop.f32.mrf.mxu1 }
 0x15e   : > { %v3230_v14 = vpop.f32.mrf.mxu3  ;;  %v901_v6 = vpop.f32.mrf.mxu2 }
 0x160   : > { %v3232_v15 = vpop.f32.mrf.mxu0 }
 0x163   : > { %v843_v27 = vpop.f32.mrf.mxu1 }
 0x166   : > { %v3235_v17 = vpop.f32.mrf.mxu3 }
 0x168   : > { %v3237_v18 = vpop.f32.mrf.mxu0 }
 0x16e   : > { %v3240_v0 = vpop.f32.mrf.mxu3 }
 0x170   : > { %v3242_v1 = vpop.f32.mrf.mxu0 }
 0x176   : > { %v942_v38 = vpop.f32.mrf.mxu3 }
 0x177   : > { %v966_v39 = vadd.f32 %v942_v38, %v910_v29  ;;  %v858_v38 = vadd.f32 %v840_v52, %v770_v24 }
 0x178   : > { %v1000_v43 = vpop.f32.mrf.mxu0 }
 0x179   : > { %v1024_v48 = vadd.f32 %v1000_v43, %v966_v39  ;;  %v494_v39 = vadd.f32 %v3224_v11, %v3185_v33  ;;  %v3302_v43 = vld [vmem:[%s3965_s5 + $0x8] sm:$0xff]  ;;  %v913_v44 = vadd.f32 %v895_v55, %v858_v38  ;;  %v3315_v33 = vld [vmem:[%s3965_s5] sm:$0xff] }
 0x17a   : > { %v1766_v52 = vrot.slane %v3315_v33, 6 }
 0x17b   : > { %v1035_v51 = vadd.f32 %v3248_v20, %v1024_v48  ;;  %v1057_v48 = vld [vmem:[%s3963_s3 + $0x30] sm:$0xff]  ;;  %v604_v8 = vadd.f32 %v3228_v13, %v494_v39 }
 0x17c   : > { %1454 = vmatpush.msra.mxu3 %v1057_v48 }
 0x17d   : > { %v3252_v49 = vmax.f32 %v1035_v51, 0.0  ;;  %v688_v13 = vadd.f32 %v3230_v14, %v604_v8 }
 0x17e   : > { %v945_v57 = vpop.f32.mrf.mxu3  ;;  %2672 = vmatpush.msk.msrb.mxu3 %vm399_vm0, %v3315_v33 }
 0x17f   : > { %v967_v10 = vadd.f32 %v945_v57, %v911_v32  ;;  %2594 = vmatmul.msk.f32.gmra.mxu1 %vm1085_vm5, %v3252_v49  ;;  %v1071_v4 = vrot.slane %v3252_v49, 7  ;;  %v1202_v50 = vrot.slane %v3252_v49, 1  ;;  %v1767_v57 = vrot.slane %v3302_v43, 6 }
 0x180   : > { %v1003_v16 = vpop.f32.mrf.mxu0  ;;  %v772_v14 = vadd.f32 %v3232_v15, %v688_v13 }
 0x181   : > { %v1025_v5 = vadd.f32 %v1003_v16, %v967_v10  ;;  %v1072_v34 = vsel %vm792_vm4, %v3204_v62, %v1071_v4  ;;  %v3263_v46 = vsel %vm510_vm1, %v1202_v50, %v3212_v3  ;;  %v859_v4 = vadd.f32 %v843_v27, %v771_v45  ;;  %v846_v16 = vpop.f32.mrf.mxu1 }
 0x182   : > { %2602 = vmatmul.msk.f32.gmra.mxu2 %vm1085_vm5, %v1072_v34  ;;  %2610 = vmatmul.msk.f32.gmra.mxu3 %vm1085_vm5, %v3263_v46 }
 0x183   : > { %v1036_v54 = vadd.f32 %v3248_v20, %v1025_v5  ;;  %2617 = vmatmul.msk.f32.vlgmr.msrb.gmra.mxu0 %vm1085_vm5, %v1072_v34  ;;  %v1768_v5 = vsel %vm536_vm3, %v1766_v52, %v1767_v57  ;;  %v914_v34 = vadd.f32 %v898_v41, %v859_v4 }
 0x184   : > { %2681 = vmatpush.msk.msrb.mxu0 %vm399_vm0, %v1768_v5 }
 0x185   : > { %v3273_v7 = vmax.f32 %v1036_v54, 0.0  ;;  %v497_v54 = vadd.f32 %v3155_v23, %v3139_v26 }
 0x186   : > { %v948_v22 = vpop.f32.mrf.mxu3 }
 0x187   : > { %v968_v25 = vadd.f32 %v948_v22, %v912_v21  ;;  %2595 = vmatmul.msk.f32.gmra.mxu1 %vm1085_vm5, %v3273_v7  ;;  %v1073_v31 = vrot.slane %v3273_v7, 7  ;;  %v1204_v59 = vrot.slane %v3273_v7, 1  ;;  %v605_v26 = vadd.f32 %v3174_v35, %v497_v54 }
 0x188   : > { %v1006_v29 = vpop.f32.mrf.mxu0 }
 0x189   : > { %v1026_v36 = vadd.f32 %v1006_v29, %v968_v25  ;;  %v3283_v58 = vsel %vm792_vm4, %v3204_v62, %v1073_v31  ;;  %v3287_v60 = vsel %vm510_vm1, %v1204_v59, %v3212_v3  ;;  %v1059_v31 = vld [vmem:[%s3963_s3 + $0x40] sm:$0xff]  ;;  %v860_v59 = vadd.f32 %v846_v16, %v772_v14  ;;  %v849_v38 = vpop.f32.mrf.mxu1 }
 0x18a   : > { %2603 = vmatmul.msk.f32.gmra.mxu2 %vm1085_vm5, %v3283_v58  ;;  %2611 = vmatmul.msk.f32.gmra.mxu3 %vm1085_vm5, %v3287_v60  ;;  %v689_v35 = vadd.f32 %v3235_v17, %v605_v26 }
 0x18b   : > { %v1037_v40 = vadd.f32 %v3248_v20, %v1026_v36  ;;  %2618 = vmatmul.msk.f32.gmra.mxu0 %vm1085_vm5, %v3283_v58  ;;  %1552 = vmatpush.msra.mxu1 %v1059_v31  ;;  %v915_v36 = vadd.f32 %v901_v6, %v860_v59 }
 0x18c   : > { %v773_v41 = vadd.f32 %v3237_v18, %v689_v35 }
 0x18d   : > { %v3304_v47 = vmax.f32 %v1037_v40, 0.0  ;;  %v500_v40 = vadd.f32 %v3166_v28, %v3147_v30 }
 0x18e   : > { %v951_v11 = vpop.f32.mrf.mxu3 }
 0x18f   : > { %v969_v51 = vadd.f32 %v951_v11, %v913_v44  ;;  %2596 = vmatmul.msk.f32.gmra.mxu1 %vm1085_vm5, %v3304_v47  ;;  %v1075_v56 = vrot.slane %v3304_v47, 7  ;;  %v1206_v32 = vrot.slane %v3304_v47, 1  ;;  %v606_v48 = vadd.f32 %v3183_v42, %v500_v40  ;;  %v904_v11 = vpop.f32.mrf.mxu2 }
 0x190   : > { %v1009_v10 = vpop.f32.mrf.mxu0 }
 0x191   : > { %v1027_v12 = vadd.f32 %v1009_v10, %v969_v51  ;;  %v3329_v50 = vsel %vm792_vm4, %v3204_v62, %v1075_v56  ;;  %v3333_v53 = vsel %vm510_vm1, %v1206_v32, %v3212_v3  ;;  %v861_v51 = vadd.f32 %v849_v38, %v773_v41  ;;  %v852_v57 = vpop.f32.mrf.mxu1 }
 0x192   : > { %2604 = vmatmul.msk.f32.gmra.mxu2 %vm1085_vm5, %v3329_v50  ;;  %2612 = vmatmul.msk.f32.gmra.mxu3 %vm1085_vm5, %v3333_v53  ;;  %v690_v18 = vadd.f32 %v3240_v0, %v606_v48 }
 0x193   : > { %v1038_v2 = vadd.f32 %v3248_v20, %v1027_v12  ;;  %2619 = vmatmul.msk.f32.gmra.mxu0 %vm1085_vm5, %v3329_v50  ;;  %v916_v32 = vadd.f32 %v904_v11, %v861_v51 }
 0x194   : > { %v774_v10 = vadd.f32 %v3242_v1, %v690_v18 }
 0x195   : > { %v3344_v55 = vmax.f32 %v1038_v2, 0.0 }
 0x196   : > { %v954_v21 = vpop.f32.mrf.mxu3  ;;  %v862_v2 = vadd.f32 %v852_v57, %v774_v10 }
 0x197   : > { %v970_v22 = vadd.f32 %v954_v21, %v914_v34  ;;  %2597 = vmatmul.msk.f32.gmra.mxu1 %vm1085_vm5, %v3344_v55  ;;  %v1077_v24 = vrot.slane %v3344_v55, 7  ;;  %v1208_v25 = vrot.slane %v3344_v55, 1  ;;  %v907_v19 = vpop.f32.mrf.mxu2 }
 0x198   : > { %v1012_v23 = vpop.f32.mrf.mxu0  ;;  %v917_v54 = vadd.f32 %v907_v19, %v862_v2 }
 0x199   : > { %v1028_v15 = vadd.f32 %v1012_v23, %v970_v22  ;;  %v3363_v37 = vsel %vm792_vm4, %v3204_v62, %v1077_v24  ;;  %v3367_v27 = vsel %vm510_vm1, %v1208_v25, %v3212_v3 }
 0x19a   : > { %2605 = vmatmul.msk.f32.gmra.mxu2 %vm1085_vm5, %v3363_v37  ;;  %2613 = vmatmul.msk.f32.gmra.mxu3 %vm1085_vm5, %v3367_v27 }
 0x19b   : > { %v1039_v29 = vadd.f32 %v3248_v20, %v1028_v15  ;;  %2620 = vmatmul.msk.f32.gmra.mxu0 %vm1085_vm5, %v3363_v37 }
 0x19d   : > { %v3377_v63 = vmax.f32 %v1039_v29, 0.0 }
 0x19e   : > { %v957_v39 = vpop.f32.mrf.mxu3 }
 0x19f   : > { %v971_v44 = vadd.f32 %v957_v39, %v915_v36  ;;  %2598 = vmatmul.msk.f32.gmra.mxu1 %vm1085_vm5, %v3377_v63  ;;  %v1079_v17 = vrot.slane %v3377_v63, 7  ;;  %v1210_v9 = vrot.slane %v3377_v63, 1 }
 0x1a0   : > { %v1015_v45 = vpop.f32.mrf.mxu0 }
 0x1a1   : > { %v1029_v56 = vadd.f32 %v1015_v45, %v971_v44  ;;  %v1080_v30 = vsel %vm792_vm4, %v3204_v62, %v1079_v17  ;;  %v3391_v28 = vsel %vm510_vm1, %v1210_v9, %v3212_v3 }
 0x1a2   : > { %2606 = vmatmul.msk.f32.gmra.mxu2 %vm1085_vm5, %v1080_v30  ;;  %2614 = vmatmul.msk.f32.gmra.mxu3 %vm1085_vm5, %v3391_v28 }
 0x1a3   : > { %v1040_v42 = vadd.f32 %v3248_v20, %v1029_v56  ;;  %2621 = vmatmul.msk.f32.gmra.mxu0 %vm1085_vm5, %v1080_v30 }
 0x1a5   : > { %v1048_v52 = vmax.f32 %v1040_v42, 0.0 }
 0x1a6   : > { %v960_v8 = vpop.f32.mrf.mxu3 }
 0x1a7   : > { %v972_v4 = vadd.f32 %v960_v8, %v916_v32  ;;  %2599 = vmatmul.msk.f32.gmra.mxu1 %vm1085_vm5, %v1048_v52  ;;  %v1081_v12 = vrot.slane %v1048_v52, 7  ;;  %v1212_v16 = vrot.slane %v1048_v52, 1 }
 0x1a8   : > { %v1018_v13 = vpop.f32.mrf.mxu0 }
 0x1a9   : > { %v1030_v5 = vadd.f32 %v1018_v13, %v972_v4  ;;  %v1082_v0 = vsel %vm792_vm4, %v3204_v62, %v1081_v12  ;;  %v3405_v34 = vsel %vm510_vm1, %v1212_v16, %v3212_v3  ;;  %v1893_v12 = vrot.slane %v3302_v43, 4 }
 0x1aa   : > { %2607 = vmatmul.msk.f32.gmra.mxu2 %vm1085_vm5, %v1082_v0  ;;  %2615 = vmatmul.msk.f32.gmra.mxu3 %vm1085_vm5, %v3405_v34 }
 0x1ab   : > { %v1041_v1 = vadd.f32 %v3248_v20, %v1030_v5  ;;  %2622 = vmatmul.msk.f32.gmra.mxu0 %vm1085_vm5, %v1082_v0  ;;  %v1839_v5 = vrot.slane %v3302_v43, 1 }
 0x1ad   : > { %v1049_v6 = vmax.f32 %v1041_v1, 0.0 }
 0x1ae   : > { %v963_v21 = vpop.f32.mrf.mxu3 }
 0x1af   : > { %v973_v14 = vadd.f32 %v963_v21, %v917_v54  ;;  %2600 = vmatmul.msk.f32.gmra.mxu1 %vm1085_vm5, %v1049_v6  ;;  %v1083_v22 = vrot.slane %v1049_v6, 7  ;;  %v1214_v24 = vrot.slane %v1049_v6, 1 }
 0x1b0   : > { %v1021_v25 = vpop.f32.mrf.mxu0 }
 0x1b1   : > { %v1031_v31 = vadd.f32 %v1021_v25, %v973_v14  ;;  %v1084_v26 = vsel %vm792_vm4, %v3204_v62, %v1083_v22  ;;  %v3417_v23 = vsel %vm510_vm1, %v1214_v24, %v3212_v3 }
 0x1b2   : > { %2608 = vmatmul.msk.f32.gmra.mxu2 %vm1085_vm5, %v1084_v26  ;;  %2616 = vmatmul.msk.f32.gmra.mxu3 %vm1085_vm5, %v3417_v23 }
 0x1b3   : > { %v1042_v59 = vadd.f32 %v3248_v20, %v1031_v31  ;;  %2623 = vmatmul.msk.f32.gmra.mxu0 %vm1085_vm5, %v1084_v26 }
 0x1b5   : > { %v1050_v15 = vmax.f32 %v1042_v59, 0.0 }
 0x1b7   : > { %2625 = vmatmul.msk.f32.vlgmr.msrb.gmra.mxu1 %vm1085_vm5, %v3252_v49  ;;  %v1282_v35 = vrot.slane %v1050_v15, 7  ;;  %v1386_v20 = vrot.slane %v1050_v15, 1 }
 0x1b8   : > { %2690 = vmatpush.msk.msrb.mxu1 %vm399_vm0, %v1839_v5 }
 0x1b9   : > { %v1283_v29 = vsel %vm792_vm4, %v3204_v62, %v1282_v35  ;;  %v1387_v49 = vsel %vm510_vm1, %v1386_v20, %v3212_v3 }
 0x1ba   : > { %2633 = vmatmul.msk.f32.vlgmr.msrb.gmra.mxu2 %vm1085_vm5, %v3263_v46  ;;  %2641 = vmatmul.msk.f32.vlgmr.msra.gmra.mxu3 %vm1085_vm5, %v3283_v58  ;;  %v1119_v46 = vpop.f32.mrf.mxu1 }
 0x1bb   : > { %2624 = vmatmul.msk.f32.gmra.mxu0 %vm1085_vm5, %v1283_v29 }
 0x1bf   : > { %2626 = vmatmul.msk.f32.gmra.mxu1 %vm1085_vm5, %v3273_v7 }
 0x1c2   : > { %2634 = vmatmul.msk.f32.gmra.mxu2 %vm1085_vm5, %v3287_v60  ;;  %2642 = vmatmul.msk.f32.gmra.mxu3 %vm1085_vm5, %v3329_v50 }
 0x1c3   : > { %2649 = vmatmul.msk.f32.vlgmr.msra.gmra.mxu0 %vm1085_vm5, %v3273_v7 }
 0x1c7   : > { %2627 = vmatmul.msk.f32.gmra.mxu1 %vm1085_vm5, %v3304_v47 }
 0x1ca   : > { %2635 = vmatmul.msk.f32.gmra.mxu2 %vm1085_vm5, %v3333_v53  ;;  %2643 = vmatmul.msk.f32.gmra.mxu3 %vm1085_vm5, %v3363_v37 }
 0x1cb   : > { %2650 = vmatmul.msk.f32.gmra.mxu0 %vm1085_vm5, %v3304_v47  ;;  %v1176_v47 = vpop.f32.mrf.mxu2 }
 0x1cc   : > { %v1177_v1 = vadd.f32 %v1176_v47, %v1119_v46 }
 0x1cf   : > { %2628 = vmatmul.msk.f32.gmra.mxu1 %vm1085_vm5, %v3344_v55 }
 0x1d2   : > { %2636 = vmatmul.msk.f32.gmra.mxu2 %vm1085_vm5, %v3367_v27  ;;  %2644 = vmatmul.msk.f32.gmra.mxu3 %vm1085_vm5, %v1080_v30 }
 0x1d3   : > { %2651 = vmatmul.msk.f32.gmra.mxu0 %vm1085_vm5, %v3344_v55  ;;  %v1632_v55 = vrot.slane %v3315_v33, 3 }
 0x1d5   : > { %2664 = vmatpush.msk.msra.mxu2 %vm399_vm0, %v1632_v55 }
 0x1d7   : > { %2629 = vmatmul.msk.f32.gmra.mxu1 %vm1085_vm5, %v3377_v63  ;;  %2699 = vmatpush.msk.msrb.mxu2 %vm399_vm0, %v1893_v12 }
 0x1da   : > { %2637 = vmatmul.msk.f32.gmra.mxu2 %vm1085_vm5, %v3391_v28  ;;  %2645 = vmatmul.msk.f32.gmra.mxu3 %vm1085_vm5, %v1082_v0 }
 0x1db   : > { %2652 = vmatmul.msk.f32.gmra.mxu0 %vm1085_vm5, %v3377_v63 }
 0x1df   : > { %2630 = vmatmul.msk.f32.gmra.mxu1 %vm1085_vm5, %v1048_v52 }
 0x1e2   : > { %2638 = vmatmul.msk.f32.gmra.mxu2 %vm1085_vm5, %v3405_v34  ;;  %2646 = vmatmul.msk.f32.gmra.mxu3 %vm1085_vm5, %v1084_v26 }
 0x1e3   : > { %2653 = vmatmul.msk.f32.gmra.mxu0 %vm1085_vm5, %v1048_v52 }
 0x1e7   : > { %2631 = vmatmul.msk.f32.gmra.mxu1 %vm1085_vm5, %v1049_v6 }
 0x1ea   : > { %2639 = vmatmul.msk.f32.gmra.mxu2 %vm1085_vm5, %v3417_v23  ;;  %2647 = vmatmul.msk.f32.gmra.mxu3 %vm1085_vm5, %v1283_v29 }
 0x1eb   : > { %2654 = vmatmul.msk.f32.gmra.mxu0 %vm1085_vm5, %v1049_v6 }
 0x1ef   : > { %2632 = vmatmul.msk.f32.gmra.mxu1 %vm1085_vm5, %v1050_v15 }
 0x1f2   : > { %2640 = vmatmul.msk.f32.gmra.mxu2 %vm1085_vm5, %v1387_v49  ;;  %2648 = vmatmul.msk.f32.gmra.mxu3 %vm1085_vm5, %v3204_v62 }
 0x1f3   : > { %2655 = vmatmul.msk.f32.gmra.mxu0 %vm1085_vm5, %v1050_v15 }
 0x1f7   : > { %2656 = vmatmul.msk.f32.vlgmr.msra.gmra.mxu1 %vm1085_vm5, %v3287_v60  ;;  %v1249_v60 = vpop.f32.mrf.mxu3 }
 0x1f8   : > { %v1273_v14 = vadd.f32 %v1249_v60, %v1177_v1 }
 0x1fa   : > { %2673 = vmatmul.msk.f32.vlgmr.msrb.gmra.mxu3 %vm382_vm2, %v3204_v62  ;;  %1667 = vmatmul.f32.vlgmr.msra.gmra.mxu2 %v2808_v61 }
 0x1fb   : > { %1525 = vmatmul.f32.gmra.mxu0 %v2808_v61 }
 0x1fc   : > { %v1122_v7 = vpop.f32.mrf.mxu1 }
 0x1ff   : > { %2657 = vmatmul.msk.f32.gmra.mxu1 %vm1085_vm5, %v3333_v53 }
 0x200   : > { %v1303_v37 = vpop.f32.mrf.mxu0 }
 0x201   : > { %v1327_v22 = vadd.f32 %v1303_v37, %v1273_v14 }
 0x203   : > { %2682 = vmatmul.msk.f32.vlgmr.msrb.gmra.mxu0 %vm382_vm2, %v3212_v3 }
 0x204   : > { %v3489_v58 = vpop.f32.mrf.mxu1 }
 0x205   : > { %v1179_v38 = vpop.f32.mrf.mxu2 }
 0x206   : > { %v1180_v24 = vadd.f32 %v1179_v38, %v1122_v7  ;;  %v3559_v7 = vld [vmem:[%s3964_s4] ss:$0 sm:$0xff] }
 0x207   : > { %2658 = vmatmul.msk.f32.gmra.mxu1 %vm1085_vm5, %v3367_v27  ;;  %v1252_v27 = vpop.f32.mrf.mxu3 }
 0x208   : > { %v1306_v63 = vpop.f32.mrf.mxu0  ;;  %v1274_v26 = vadd.f32 %v1252_v27, %v1180_v24 }
 0x20a   : > { %v1328_v29 = vadd.f32 %v1306_v63, %v1274_v26 }
 0x20c   : > { %v3493_v50 = vpop.f32.mrf.mxu1 }
 0x20d   : > { %v1182_v40 = vpop.f32.mrf.mxu2 }
 0x20e   : > { %v1183_v20 = vadd.f32 %v1182_v40, %v3489_v58 }
 0x20f   : > { %2659 = vmatmul.msk.f32.gmra.mxu1 %vm1085_vm5, %v3391_v28  ;;  %v1255_v33 = vpop.f32.mrf.mxu3 }
 0x210   : > { %v1309_v41 = vpop.f32.mrf.mxu0  ;;  %v1275_v47 = vadd.f32 %v1255_v33, %v1183_v20 }
 0x214   : > { %v3498_v53 = vpop.f32.mrf.mxu1 }
 0x215   : > { %v1185_v44 = vpop.f32.mrf.mxu2 }
 0x216   : > { %v1186_v27 = vadd.f32 %v1185_v44, %v3493_v50 }
 0x217   : > { %2660 = vmatmul.msk.f32.gmra.mxu1 %vm1085_vm5, %v3405_v34  ;;  %v1258_v9 = vpop.f32.mrf.mxu3 }
 0x218   : > { %v3515_v48 = vpop.f32.mrf.mxu0 }
 0x21c   : > { %v3504_v36 = vpop.f32.mrf.mxu1 }
 0x21d   : > { %v3517_v11 = vpop.f32.mrf.mxu2 }
 0x21f   : > { %2661 = vmatmul.msk.f32.gmra.mxu1 %vm1085_vm5, %v3417_v23  ;;  %v3519_v51 = vpop.f32.mrf.mxu3 }
 0x220   : > { %v3521_v56 = vpop.f32.mrf.mxu0 }
 0x224   : > { %v3508_v39 = vpop.f32.mrf.mxu1 }
 0x225   : > { %v3523_v30 = vpop.f32.mrf.mxu2 }
 0x227   : > { %2662 = vmatmul.msk.f32.gmra.mxu1 %vm1085_vm5, %v1387_v49  ;;  %v3525_v18 = vpop.f32.mrf.mxu3 }
 0x228   : > { %v3527_v32 = vpop.f32.mrf.mxu0 }
 0x22c   : > { %v3511_v17 = vpop.f32.mrf.mxu1 }
 0x22d   : > { %v3529_v52 = vpop.f32.mrf.mxu2 }
 0x22f   : > { %2663 = vmatmul.msk.f32.gmra.mxu1 %vm1085_vm5, %v3212_v3  ;;  %v3531_v57 = vpop.f32.mrf.mxu3 }
 0x230   : > { %v3535_v10 = vpop.f32.mrf.mxu0 }
 0x234   : > { %v1354_v45 = vpop.f32.mrf.mxu1 }
 0x235   : > { %v3537_v4 = vpop.f32.mrf.mxu2  ;;  %v1378_v25 = vadd.f32 %v1354_v45, %v1327_v22  ;;  %v1329_v45 = vadd.f32 %v1309_v41, %v1275_v47  ;;  %v1192_v47 = vadd.f32 %v3523_v30, %v3504_v36 }
 0x237   : > { %v3543_v13 = vpop.f32.mrf.mxu3 }
 0x238   : > { %v3545_v2 = vpop.f32.mrf.mxu0 }
 0x23c   : > { %v1357_v28 = vpop.f32.mrf.mxu1 }
 0x23d   : > { %v1407_v0 = vpop.f32.mrf.mxu2  ;;  %v1379_v46 = vadd.f32 %v1357_v28, %v1328_v29 }
 0x23e   : > { %v1431_v23 = vadd.f32 %v1407_v0, %v1378_v25  ;;  %v1276_v0 = vadd.f32 %v1258_v9, %v1186_v27  ;;  %v1189_v9 = vadd.f32 %v3517_v11, %v3498_v53  ;;  %v1278_v27 = vadd.f32 %v3525_v18, %v1192_v47 }
 0x23f   : > { %v1456_v19 = vpop.f32.mrf.mxu3  ;;  %v1195_v18 = vadd.f32 %v3529_v52, %v3508_v39  ;;  %v1607_v39 = vld [vmem:[%s3965_s5 + $0x10] sm:$0xff]  ;;  %v1950_v52 = vrot.slane %v3302_v43, 7 }
 0x240   : > { %v1505_v54 = vpop.f32.mrf.mxu0  ;;  %v1480_v49 = vadd.f32 %v1456_v19, %v1431_v23  ;;  %v1330_v22 = vadd.f32 %v3515_v48, %v1276_v0  ;;  %v1277_v53 = vadd.f32 %v3519_v51, %v1189_v9 }
 0x242   : > { %v1529_v55 = vadd.f32 %v1505_v54, %v1480_v49  ;;  %v1331_v51 = vadd.f32 %v3521_v56, %v1277_v53  ;;  %v1198_v53 = vadd.f32 %v3537_v4, %v3511_v17 }
 0x244   : > { %v1360_v42 = vpop.f32.mrf.mxu1  ;;  %v1280_v4 = vadd.f32 %v3543_v13, %v1198_v53 }
 0x245   : > { %v1410_v6 = vpop.f32.mrf.mxu2  ;;  %v1380_v28 = vadd.f32 %v1360_v42, %v1329_v45 }
 0x246   : > { %v1432_v12 = vadd.f32 %v1410_v6, %v1379_v46  ;;  %v1334_v13 = vadd.f32 %v3545_v2, %v1280_v4  ;;  %v2181_v4 = vld [vmem:[%s3967_s7] sm:$0xff] }
 0x247   : > { %v1459_v31 = vpop.f32.mrf.mxu3 }
 0x248   : > { %v1508_v15 = vpop.f32.mrf.mxu0  ;;  %v1481_v5 = vadd.f32 %v1459_v31, %v1432_v12 }
 0x24a   : > { %v1530_v19 = vadd.f32 %v1508_v15, %v1481_v5 }
 0x24c   : > { %v3533_v8 = vpop.f32.mrf.mxu1 }
 0x24d   : > { %v1413_v35 = vpop.f32.mrf.mxu2  ;;  %v1381_v31 = vadd.f32 %v3533_v8, %v1330_v22  ;;  %v1608_v22 = vld [vmem:[%s3965_s5 + $0x18] sm:$0x7] }
 0x24e   : > { %v1433_v1 = vadd.f32 %v1413_v35, %v1380_v28  ;;  %2734 = vmatpush.msk.msra.mxu2 %vm399_vm0, %v1608_v22 }
 0x24f   : > { %v1462_v60 = vpop.f32.mrf.mxu3 }
 0x250   : > { %v1511_v63 = vpop.f32.mrf.mxu0  ;;  %v1482_v24 = vadd.f32 %v1462_v60, %v1433_v1 }
 0x252   : > { %v1531_v15 = vadd.f32 %v1511_v63, %v1482_v24  ;;  %v2006_v24 = vrot.slane %v1607_v39, 2 }
 0x254   : > { %v3540_v16 = vpop.f32.mrf.mxu1  ;;  %2717 = vmatpush.msk.msra.mxu0 %vm399_vm0, %v2006_v24 }
 0x255   : > { %v1416_v40 = vpop.f32.mrf.mxu2  ;;  %v1382_v60 = vadd.f32 %v3540_v16, %v1331_v51 }
 0x256   : > { %v1434_v35 = vadd.f32 %v1416_v40, %v1381_v31  ;;  %2298 = vmatpush.msrb.mxu0 %v2181_v4 }
 0x257   : > { %v1465_v14 = vpop.f32.mrf.mxu3 }
 0x258   : > { %v1514_v26 = vpop.f32.mrf.mxu0 }
 0x25c   : > { %v3549_v34 = vpop.f32.mrf.mxu1 }
 0x25d   : > { %v1419_v11 = vpop.f32.mrf.mxu2 }
 0x25e   : > { %v1435_v56 = vadd.f32 %v1419_v11, %v1382_v60 }
 0x260   : > { %v1517_v5 = vpop.f32.mrf.mxu0 }
 0x264   : > { %v3551_v21 = vpop.f32.mrf.mxu1 }
 0x265   : > { %v1422_v63 = vpop.f32.mrf.mxu2 }
 0x268   : > { %v1520_v11 = vpop.f32.mrf.mxu0 }
 0x26c   : > { %v3553_v59 = vpop.f32.mrf.mxu1 }
 0x274   : > { %v1554_v37 = vpop.f32.mrf.mxu1 }
 0x275   : > { %v1578_v38 = vadd.f32 %v1554_v37, %v1529_v55  ;;  %v1483_v55 = vadd.f32 %v1465_v14, %v1434_v35  ;;  %v1468_v37 = vpop.f32.mrf.mxu3 }
 0x276   : > { %v1484_v0 = vadd.f32 %v1468_v37, %v1435_v56 }
 0x277   : > { %v1589_v58 = vadd.f32 %v3559_v7, %v1578_v38  ;;  %v1532_v45 = vadd.f32 %v1514_v26, %v1483_v55 }
 0x279   : > { %v3563_v33 = vmax.f32 %v1589_v58, 0.0 }
 0x27b   : > { %2665 = vmatmul.msk.f32.gmra.mxu2 %vm382_vm2, %v3563_v33  ;;  %v1617_v54 = vrot.slane %v3563_v33, 7  ;;  %v1751_v6 = vrot.slane %v3563_v33, 1 }
 0x27c   : > { %v1557_v50 = vpop.f32.mrf.mxu1 }
 0x27d   : > { %v1579_v41 = vadd.f32 %v1557_v50, %v1530_v19  ;;  %v1618_v44 = vsel %vm792_vm4, %v3204_v62, %v1617_v54  ;;  %v3573_v42 = vsel %vm510_vm1, %v1751_v6, %v3212_v3  ;;  %v1332_v19 = vadd.f32 %v3527_v32, %v1278_v27 }
 0x27e   : > { %2674 = vmatmul.msk.f32.gmra.mxu3 %vm382_vm2, %v1618_v44  ;;  %2683 = vmatmul.msk.f32.gmra.mxu0 %vm382_vm2, %v3573_v42  ;;  %v1279_v50 = vadd.f32 %v3531_v57, %v1195_v18  ;;  %v1951_v32 = vrot.slane %v1607_v39, 7 }
 0x27f   : > { %v1590_v25 = vadd.f32 %v3559_v7, %v1579_v41  ;;  %2691 = vmatmul.msk.f32.vlgmr.msrb.gmra.mxu1 %vm382_vm2, %v1618_v44  ;;  %v1383_v54 = vadd.f32 %v3549_v34, %v1332_v19  ;;  %v1533_v41 = vadd.f32 %v1517_v5, %v1484_v0  ;;  %v1471_v44 = vpop.f32.mrf.mxu3  ;;  %v1523_v5 = vpop.f32.mrf.mxu0 }
 0x280   : > { %v1952_v43 = vsel %vm792_vm4, %v1950_v52, %v1951_v32  ;;  %v1333_v35 = vadd.f32 %v3535_v10, %v1279_v50 }
 0x281   : > { %v3584_v23 = vmax.f32 %v1590_v25, 0.0  ;;  %v1436_v9 = vadd.f32 %v1422_v63, %v1383_v54  ;;  %2708 = vmatpush.msk.msra.mxu3 %vm399_vm0, %v1952_v43 }
 0x283   : > { %2666 = vmatmul.msk.f32.gmra.mxu2 %vm382_vm2, %v3584_v23  ;;  %v1619_v48 = vrot.slane %v3584_v23, 7  ;;  %v1753_v29 = vrot.slane %v3584_v23, 1 }
 0x284   : > { %v1560_v20 = vpop.f32.mrf.mxu1 }
 0x285   : > { %v1580_v49 = vadd.f32 %v1560_v20, %v1531_v15  ;;  %v3593_v8 = vsel %vm792_vm4, %v3204_v62, %v1619_v48  ;;  %v3597_v46 = vsel %vm510_vm1, %v1753_v29, %v3212_v3  ;;  %v1425_v15 = vpop.f32.mrf.mxu2  ;;  %v1485_v48 = vadd.f32 %v1471_v44, %v1436_v9 }
 0x286   : > { %2675 = vmatmul.msk.f32.gmra.mxu3 %vm382_vm2, %v3593_v8  ;;  %2684 = vmatmul.msk.f32.gmra.mxu0 %vm382_vm2, %v3597_v46  ;;  %v2058_v20 = vrot.slane %v1607_v39, 5 }
 0x287   : > { %v1591_v12 = vadd.f32 %v3559_v7, %v1580_v49  ;;  %2692 = vmatmul.msk.f32.gmra.mxu1 %vm382_vm2, %v3593_v8  ;;  %v1384_v49 = vadd.f32 %v3551_v21, %v1333_v35  ;;  %v1534_v51 = vadd.f32 %v1520_v11, %v1485_v48  ;;  %v1526_v50 = vpop.f32.mrf.mxu0 }
 0x288   : > { %2726 = vmatpush.msk.msra.mxu1 %vm399_vm0, %v2058_v20  ;;  %v2184_v20 = vld [vmem:[%s3967_s7 + $0x18] sm:$0xff] }
 0x289   : > { %v3610_v38 = vmax.f32 %v1591_v12, 0.0  ;;  %v1437_v47 = vadd.f32 %v1425_v15, %v1384_v49  ;;  %v1474_v12 = vpop.f32.mrf.mxu3 }
 0x28b   : > { %2667 = vmatmul.msk.f32.gmra.mxu2 %vm382_vm2, %v3610_v38  ;;  %v1621_v36 = vrot.slane %v3610_v38, 7  ;;  %v1755_v30 = vrot.slane %v3610_v38, 1  ;;  %v1486_v27 = vadd.f32 %v1474_v12, %v1437_v47  ;;  %v2183_v47 = vld [vmem:[%s3967_s7 + $0x10] sm:$0xff] }
 0x28c   : > { %v1563_v58 = vpop.f32.mrf.mxu1  ;;  %2339 = vmatpush.msrb.mxu1 %v2183_v47 }
 0x28d   : > { %v1581_v40 = vadd.f32 %v1563_v58, %v1532_v45  ;;  %v3619_v16 = vsel %vm792_vm4, %v3204_v62, %v1621_v36  ;;  %v3623_v28 = vsel %vm510_vm1, %v1755_v30, %v3212_v3  ;;  %v1428_v36 = vpop.f32.mrf.mxu2  ;;  %v1385_v30 = vadd.f32 %v3553_v59, %v1334_v13 }
 0x28e   : > { %2676 = vmatmul.msk.f32.gmra.mxu3 %vm382_vm2, %v3619_v16  ;;  %2685 = vmatmul.msk.f32.gmra.mxu0 %vm382_vm2, %v3623_v28  ;;  %v1535_v58 = vadd.f32 %v1523_v5, %v1486_v27 }
 0x28f   : > { %v1592_v1 = vadd.f32 %v3559_v7, %v1581_v40  ;;  %2693 = vmatmul.msk.f32.gmra.mxu1 %vm382_vm2, %v3619_v16  ;;  %v1438_v40 = vadd.f32 %v1428_v36, %v1385_v30 }
 0x291   : > { %v3636_v6 = vmax.f32 %v1592_v1, 0.0  ;;  %v1477_v19 = vpop.f32.mrf.mxu3 }
 0x292   : > { %v1487_v59 = vadd.f32 %v1477_v19, %v1438_v40 }
 0x293   : > { %2668 = vmatmul.msk.f32.gmra.mxu2 %vm382_vm2, %v3636_v6  ;;  %v1623_v14 = vrot.slane %v3636_v6, 7  ;;  %v1757_v34 = vrot.slane %v3636_v6, 1 }
 0x294   : > { %v1566_v25 = vpop.f32.mrf.mxu1  ;;  %v1536_v44 = vadd.f32 %v1526_v50, %v1487_v59 }
 0x295   : > { %v1582_v57 = vadd.f32 %v1566_v25, %v1533_v41  ;;  %v3654_v31 = vsel %vm792_vm4, %v3204_v62, %v1623_v14  ;;  %v3658_v26 = vsel %vm510_vm1, %v1757_v34, %v3212_v3 }
 0x296   : > { %2677 = vmatmul.msk.f32.gmra.mxu3 %vm382_vm2, %v3654_v31  ;;  %2686 = vmatmul.msk.f32.gmra.mxu0 %vm382_vm2, %v3658_v26 }
 0x297   : > { %v1593_v29 = vadd.f32 %v3559_v7, %v1582_v57  ;;  %2694 = vmatmul.msk.f32.gmra.mxu1 %vm382_vm2, %v3654_v31 }
 0x299   : > { %v3673_v17 = vmax.f32 %v1593_v29, 0.0  ;;  %v2182_v29 = vld [vmem:[%s3967_s7 + $0x8] sm:$0xff] }
 0x29a   : > { %2241 = vmatpush.msrb.mxu3 %v2182_v29 }
 0x29b   : > { %2669 = vmatmul.msk.f32.gmra.mxu2 %vm382_vm2, %v3673_v17  ;;  %v1625_v10 = vrot.slane %v3673_v17, 7  ;;  %v1759_v55 = vrot.slane %v3673_v17, 1 }
 0x29c   : > { %v1569_v60 = vpop.f32.mrf.mxu1 }
 0x29d   : > { %v1583_v37 = vadd.f32 %v1569_v60, %v1534_v51  ;;  %v1626_v21 = vsel %vm792_vm4, %v3204_v62, %v1625_v10  ;;  %v3685_v56 = vsel %vm510_vm1, %v1759_v55, %v3212_v3 }
 0x29e   : > { %2678 = vmatmul.msk.f32.gmra.mxu3 %vm382_vm2, %v1626_v21  ;;  %2687 = vmatmul.msk.f32.gmra.mxu0 %vm382_vm2, %v3685_v56 }
 0x29f   : > { %v1594_v45 = vadd.f32 %v3559_v7, %v1583_v37  ;;  %2695 = vmatmul.msk.f32.gmra.mxu1 %vm382_vm2, %v1626_v21 }
 0x2a1   : > { %v1602_v63 = vmax.f32 %v1594_v45, 0.0 }
 0x2a3   : > { %2670 = vmatmul.msk.f32.gmra.mxu2 %vm382_vm2, %v1602_v63  ;;  %v1627_v18 = vrot.slane %v1602_v63, 7  ;;  %v1761_v0 = vrot.slane %v1602_v63, 1 }
 0x2a4   : > { %v1572_v1 = vpop.f32.mrf.mxu1 }
 0x2a5   : > { %v1584_v54 = vadd.f32 %v1572_v1, %v1535_v58  ;;  %v1628_v2 = vsel %vm792_vm4, %v3204_v62, %v1627_v18  ;;  %v3699_v39 = vsel %vm510_vm1, %v1761_v0, %v3212_v3 }
 0x2a6   : > { %2679 = vmatmul.msk.f32.gmra.mxu3 %vm382_vm2, %v1628_v2  ;;  %2688 = vmatmul.msk.f32.gmra.mxu0 %vm382_vm2, %v3699_v39 }
 0x2a7   : > { %v1595_v52 = vadd.f32 %v3559_v7, %v1584_v54  ;;  %2696 = vmatmul.msk.f32.gmra.mxu1 %vm382_vm2, %v1628_v2 }
 0x2a9   : > { %v1603_v41 = vmax.f32 %v1595_v52, 0.0 }
 0x2ab   : > { %2671 = vmatmul.msk.f32.gmra.mxu2 %vm382_vm2, %v1603_v41  ;;  %v1629_v32 = vrot.slane %v1603_v41, 7  ;;  %v1763_v9 = vrot.slane %v1603_v41, 1 }
 0x2ac   : > { %v1575_v14 = vpop.f32.mrf.mxu1 }
 0x2ad   : > { %v1585_v34 = vadd.f32 %v1575_v14, %v1536_v44  ;;  %v1630_v22 = vsel %vm792_vm4, %v3204_v62, %v1629_v32  ;;  %v1764_v24 = vsel %vm510_vm1, %v1763_v9, %v3212_v3 }
 0x2ae   : > { %2680 = vmatmul.msk.f32.gmra.mxu3 %vm382_vm2, %v1630_v22  ;;  %2689 = vmatmul.msk.f32.gmra.mxu0 %vm382_vm2, %v1764_v24 }
 0x2af   : > { %v1596_v25 = vadd.f32 %v3559_v7, %v1585_v34  ;;  %2697 = vmatmul.msk.f32.gmra.mxu1 %vm382_vm2, %v1630_v22 }
 0x2b1   : > { %v1604_v43 = vmax.f32 %v1596_v25, 0.0 }
 0x2b3   : > { %2700 = vmatmul.msk.f32.vlgmr.msrb.gmra.mxu2 %vm382_vm2, %v3563_v33  ;;  %v1837_v57 = vrot.slane %v1604_v43, 7  ;;  %v1947_v7 = vrot.slane %v1604_v43, 1 }
 0x2b4   : > { %2388 = vmatpush.msrb.mxu2 %v2184_v20 }
 0x2b5   : > { %v1838_v53 = vsel %vm792_vm4, %v3204_v62, %v1837_v57  ;;  %v1948_v33 = vsel %vm510_vm1, %v1947_v7, %v3212_v3 }
 0x2b6   : > { %2709 = vmatmul.msk.f32.vlgmr.msra.gmra.mxu3 %vm382_vm2, %v3573_v42  ;;  %2718 = vmatmul.msk.f32.vlgmr.msra.gmra.mxu0 %vm382_vm2, %v3593_v8  ;;  %v1668_v42 = vpop.f32.mrf.mxu2 }
 0x2b7   : > { %2698 = vmatmul.msk.f32.gmra.mxu1 %vm382_vm2, %v1838_v53 }
 0x2bb   : > { %2701 = vmatmul.msk.f32.gmra.mxu2 %vm382_vm2, %v3584_v23 }
 0x2be   : > { %2710 = vmatmul.msk.f32.gmra.mxu3 %vm382_vm2, %v3597_v46  ;;  %2719 = vmatmul.msk.f32.gmra.mxu0 %vm382_vm2, %v3619_v16  ;;  %v1804_v16 = vpop.f32.mrf.mxu0 }
 0x2bf   : > { %2727 = vmatmul.msk.f32.vlgmr.msra.gmra.mxu1 %vm382_vm2, %v3584_v23 }
 0x2c3   : > { %2702 = vmatmul.msk.f32.gmra.mxu2 %vm382_vm2, %v3610_v38 }
 0x2c6   : > { %2711 = vmatmul.msk.f32.gmra.mxu3 %vm382_vm2, %v3623_v28  ;;  %2720 = vmatmul.msk.f32.gmra.mxu0 %vm382_vm2, %v3654_v31 }
 0x2c7   : > { %2728 = vmatmul.msk.f32.gmra.mxu1 %vm382_vm2, %v3610_v38 }
 0x2cb   : > { %2703 = vmatmul.msk.f32.gmra.mxu2 %vm382_vm2, %v3636_v6 }
 0x2ce   : > { %2712 = vmatmul.msk.f32.gmra.mxu3 %vm382_vm2, %v3658_v26  ;;  %2721 = vmatmul.msk.f32.gmra.mxu0 %vm382_vm2, %v1626_v21 }
 0x2cf   : > { %2729 = vmatmul.msk.f32.gmra.mxu1 %vm382_vm2, %v3636_v6 }
 0x2d3   : > { %2704 = vmatmul.msk.f32.gmra.mxu2 %vm382_vm2, %v3673_v17 }
 0x2d6   : > { %2713 = vmatmul.msk.f32.gmra.mxu3 %vm382_vm2, %v3685_v56  ;;  %2722 = vmatmul.msk.f32.gmra.mxu0 %vm382_vm2, %v1628_v2 }
 0x2d7   : > { %2730 = vmatmul.msk.f32.gmra.mxu1 %vm382_vm2, %v3673_v17 }
 0x2db   : > { %2705 = vmatmul.msk.f32.gmra.mxu2 %vm382_vm2, %v1602_v63 }
 0x2de   : > { %2714 = vmatmul.msk.f32.gmra.mxu3 %vm382_vm2, %v3699_v39  ;;  %2723 = vmatmul.msk.f32.gmra.mxu0 %vm382_vm2, %v1630_v22 }
 0x2df   : > { %2731 = vmatmul.msk.f32.gmra.mxu1 %vm382_vm2, %v1602_v63 }
 0x2e3   : > { %2706 = vmatmul.msk.f32.gmra.mxu2 %vm382_vm2, %v1603_v41 }
 0x2e6   : > { %2715 = vmatmul.msk.f32.gmra.mxu3 %vm382_vm2, %v1764_v24  ;;  %2724 = vmatmul.msk.f32.gmra.mxu0 %vm382_vm2, %v1838_v53 }
 0x2e7   : > { %2732 = vmatmul.msk.f32.gmra.mxu1 %vm382_vm2, %v1603_v41 }
 0x2eb   : > { %2707 = vmatmul.msk.f32.gmra.mxu2 %vm382_vm2, %v1604_v43 }
 0x2ee   : > { %2716 = vmatmul.msk.f32.gmra.mxu3 %vm382_vm2, %v1948_v33  ;;  %2725 = vmatmul.msk.f32.gmra.mxu0 %vm382_vm2, %v3204_v62  ;;  %v1727_v62 = vpop.f32.mrf.mxu3 }
 0x2ef   : > { %2733 = vmatmul.msk.f32.gmra.mxu1 %vm382_vm2, %v1604_v43  ;;  %v1728_v2 = vadd.f32 %v1727_v62, %v1668_v42 }
 0x2f1   : > { %v1828_v59 = vadd.f32 %v1804_v16, %v1728_v2 }
 0x2f3   : > { %2735 = vmatmul.msk.f32.vlgmr.msra.gmra.mxu2 %vm382_vm2, %v3597_v46 }
 0x2f7   : > { %2098 = vmatmul.f32.gmra.mxu1 %v2808_v61 }
 0x2fb   : > { %2736 = vmatmul.msk.f32.gmra.mxu2 %vm382_vm2, %v3623_v28  ;;  %v1807_v28 = vpop.f32.mrf.mxu0 }
 0x2fc   : > { %v1861_v46 = vpop.f32.mrf.mxu1 }
 0x2fd   : > { %v1885_v44 = vadd.f32 %v1861_v46, %v1828_v59 }
 0x2fe   : > { %v1671_v23 = vpop.f32.mrf.mxu2 }
 0x301   : > { %v1730_v6 = vpop.f32.mrf.mxu3 }
 0x302   : > { %v1731_v32 = vadd.f32 %v1730_v6, %v1671_v23  ;;  %v3843_v23 = vld [vmem:[%s3966_s6] ss:$0 sm:$0xff] }
 0x303   : > { %2737 = vmatmul.msk.f32.gmra.mxu2 %vm382_vm2, %v3658_v26  ;;  %v1810_v35 = vpop.f32.mrf.mxu0 }
 0x304   : > { %v1864_v11 = vpop.f32.mrf.mxu1  ;;  %v1829_v14 = vadd.f32 %v1807_v28, %v1731_v32 }
 0x306   : > { %v3777_v8 = vpop.f32.mrf.mxu2  ;;  %v1886_v25 = vadd.f32 %v1864_v11, %v1829_v14 }
 0x309   : > { %v1733_v15 = vpop.f32.mrf.mxu3 }
 0x30a   : > { %v1734_v43 = vadd.f32 %v1733_v15, %v3777_v8 }
 0x30b   : > { %2738 = vmatmul.msk.f32.gmra.mxu2 %vm382_vm2, %v3685_v56  ;;  %v1813_v10 = vpop.f32.mrf.mxu0 }
 0x30c   : > { %v1867_v49 = vpop.f32.mrf.mxu1  ;;  %v1830_v42 = vadd.f32 %v1810_v35, %v1734_v43 }
 0x30e   : > { %v3781_v38 = vpop.f32.mrf.mxu2  ;;  %v1887_v28 = vadd.f32 %v1867_v49, %v1830_v42 }
 0x311   : > { %v1736_v17 = vpop.f32.mrf.mxu3 }
 0x312   : > { %v1737_v29 = vadd.f32 %v1736_v17, %v3781_v38 }
 0x313   : > { %2739 = vmatmul.msk.f32.gmra.mxu2 %vm382_vm2, %v3699_v39  ;;  %v3809_v37 = vpop.f32.mrf.mxu0 }
 0x314   : > { %v1870_v55 = vpop.f32.mrf.mxu1  ;;  %v1831_v35 = vadd.f32 %v1813_v10, %v1737_v29 }
 0x316   : > { %v3785_v31 = vpop.f32.mrf.mxu2  ;;  %v1888_v59 = vadd.f32 %v1870_v55, %v1831_v35 }
 0x319   : > { %v1739_v12 = vpop.f32.mrf.mxu3 }
 0x31a   : > { %v1740_v49 = vadd.f32 %v1739_v12, %v3785_v31 }
 0x31b   : > { %2740 = vmatmul.msk.f32.gmra.mxu2 %vm382_vm2, %v1764_v24  ;;  %v3815_v27 = vpop.f32.mrf.mxu0 }
 0x31c   : > { %v3811_v21 = vpop.f32.mrf.mxu1 }
 0x31e   : > { %v3788_v26 = vpop.f32.mrf.mxu2 }
 0x321   : > { %v3813_v56 = vpop.f32.mrf.mxu3 }
 0x323   : > { %2741 = vmatmul.msk.f32.gmra.mxu2 %vm382_vm2, %v1948_v33  ;;  %v3821_v30 = vpop.f32.mrf.mxu0 }
 0x324   : > { %v3817_v5 = vpop.f32.mrf.mxu1 }
 0x326   : > { %v3791_v48 = vpop.f32.mrf.mxu2 }
 0x329   : > { %v3819_v36 = vpop.f32.mrf.mxu3 }
 0x32b   : > { %2742 = vmatmul.msk.f32.gmra.mxu2 %vm382_vm2, %v3212_v3  ;;  %v3829_v0 = vpop.f32.mrf.mxu0 }
 0x32c   : > { %v3823_v58 = vpop.f32.mrf.mxu1 }
 0x32e   : > { %v3804_v51 = vpop.f32.mrf.mxu2 }
 0x331   : > { %v3825_v40 = vpop.f32.mrf.mxu3 }
 0x333   : > { %v2026_v39 = vpop.f32.mrf.mxu0 }
 0x334   : > { %v3831_v19 = vpop.f32.mrf.mxu1 }
 0x336   : > { %v1915_v60 = vpop.f32.mrf.mxu2 }
 0x337   : > { %v1939_v9 = vadd.f32 %v1915_v60, %v1885_v44  ;;  %v1832_v44 = vadd.f32 %v3809_v37, %v1740_v49 }
 0x339   : > { %v1974_v1 = vpop.f32.mrf.mxu3  ;;  %v1889_v12 = vadd.f32 %v3811_v21, %v1832_v44 }
 0x33a   : > { %v1998_v22 = vadd.f32 %v1974_v1, %v1939_v9 }
 0x33b   : > { %v2029_v34 = vpop.f32.mrf.mxu0 }
 0x33c   : > { %v2078_v52 = vpop.f32.mrf.mxu1  ;;  %v2050_v7 = vadd.f32 %v2026_v39, %v1998_v22 }
 0x33e   : > { %v1918_v13 = vpop.f32.mrf.mxu2  ;;  %v2102_v62 = vadd.f32 %v2078_v52, %v2050_v7 }
 0x33f   : > { %v1940_v33 = vadd.f32 %v1918_v13, %v1886_v25 }
 0x341   : > { %v1977_v50 = vpop.f32.mrf.mxu3 }
 0x342   : > { %v1999_v16 = vadd.f32 %v1977_v50, %v1940_v33 }
 0x343   : > { %v2032_v46 = vpop.f32.mrf.mxu0 }
 0x344   : > { %v2081_v57 = vpop.f32.mrf.mxu1  ;;  %v2051_v20 = vadd.f32 %v2029_v34, %v1999_v16 }
 0x346   : > { %v1921_v45 = vpop.f32.mrf.mxu2  ;;  %v2103_v13 = vadd.f32 %v2081_v57, %v2051_v20 }
 0x347   : > { %v1941_v8 = vadd.f32 %v1921_v45, %v1887_v28 }
 0x349   : > { %v1980_v53 = vpop.f32.mrf.mxu3 }
 0x34a   : > { %v2000_v1 = vadd.f32 %v1980_v53, %v1941_v8 }
 0x34b   : > { %v2035_v17 = vpop.f32.mrf.mxu0 }
 0x34c   : > { %v2084_v15 = vpop.f32.mrf.mxu1  ;;  %v2052_v45 = vadd.f32 %v2032_v46, %v2000_v1 }
 0x34e   : > { %v1924_v63 = vpop.f32.mrf.mxu2  ;;  %v2104_v34 = vadd.f32 %v2084_v15, %v2052_v45 }
 0x34f   : > { %v1942_v50 = vadd.f32 %v1924_v63, %v1888_v59  ;;  %v1743_v63 = vadd.f32 %v3813_v56, %v3788_v26 }
 0x351   : > { %v1983_v47 = vpop.f32.mrf.mxu3  ;;  %v1833_v33 = vadd.f32 %v3815_v27, %v1743_v63 }
 0x352   : > { %v2001_v55 = vadd.f32 %v1983_v47, %v1942_v50 }
 0x353   : > { %v2038_v7 = vpop.f32.mrf.mxu0 }
 0x354   : > { %v2087_v32 = vpop.f32.mrf.mxu1  ;;  %v2053_v43 = vadd.f32 %v2035_v17, %v2001_v55 }
 0x356   : > { %v3827_v18 = vpop.f32.mrf.mxu2  ;;  %v2105_v42 = vadd.f32 %v2087_v32, %v2053_v43 }
 0x357   : > { %v1943_v57 = vadd.f32 %v3827_v18, %v1889_v12  ;;  %v1746_v18 = vadd.f32 %v3819_v36, %v3791_v48 }
 0x359   : > { %v1986_v14 = vpop.f32.mrf.mxu3  ;;  %v1834_v8 = vadd.f32 %v3821_v30, %v1746_v18 }
 0x35b   : > { %v1891_v35 = vadd.f32 %v3823_v58, %v1834_v8 }
 0x35c   : > { %v2090_v26 = vpop.f32.mrf.mxu1 }
 0x35e   : > { %v3833_v54 = vpop.f32.mrf.mxu2 }
 0x361   : > { %v1989_v16 = vpop.f32.mrf.mxu3 }
 0x364   : > { %v2093_v30 = vpop.f32.mrf.mxu1 }
 0x366   : > { %v3835_v41 = vpop.f32.mrf.mxu2 }
 0x369   : > { %v1992_v1 = vpop.f32.mrf.mxu3 }
 0x36c   : > { %v2096_v32 = vpop.f32.mrf.mxu1 }
 0x36e   : > { %v3837_v24 = vpop.f32.mrf.mxu2 }
 0x376   : > { %v2130_v6 = vpop.f32.mrf.mxu2 }
 0x377   : > { %v2154_v11 = vadd.f32 %v2130_v6, %v2102_v62  ;;  %v2002_v62 = vadd.f32 %v1986_v14, %v1943_v57  ;;  %v1890_v6 = vadd.f32 %v3817_v5, %v1833_v33  ;;  %v2041_v5 = vpop.f32.mrf.mxu0 }
 0x379   : > { %v2165_v4 = vadd.f32 %v3843_v23, %v2154_v11  ;;  %v2054_v29 = vadd.f32 %v2038_v7, %v2002_v62  ;;  %v1944_v11 = vadd.f32 %v3833_v54, %v1890_v6 }
 0x37b   : > { %v2173_v60 = vmax.f32 %v2165_v4, 0.0  ;;  %v2106_v4 = vadd.f32 %v2090_v26, %v2054_v29  ;;  %v2003_v47 = vadd.f32 %v1989_v16, %v1944_v11  ;;  %v3925_v11 = vld [vmem:[%s3968_s8] ss:$0 sm:$0xff] }
 0x37d   : > { %v2194_v2 = vrot.slane %v2173_v60, 1  ;;  %2751 = vmatmul.msk.f32.vlgmr.msrb.gmra.mxu0 %vm1085_vm5, %v2173_v60  ;;  %v1749_v60 = vadd.f32 %v3825_v40, %v3804_v51 }
 0x37e   : > { %v2133_v39 = vpop.f32.mrf.mxu2 }
 0x37f   : > { %v2155_v52 = vadd.f32 %v2133_v39, %v2103_v13  ;;  %v2195_v38 = vsel %vm510_vm1, %v2194_v2, %v3212_v3  ;;  %v2055_v2 = vadd.f32 %v2041_v5, %v2003_v47  ;;  %v1945_v39 = vadd.f32 %v3835_v41, %v1891_v35 }
 0x380   : > { %2743 = vmatmul.msk.f32.vlgmr.msrb.gmra.mxu3 %vm1085_vm5, %v2195_v38  ;;  %v1835_v58 = vadd.f32 %v3829_v0, %v1749_v60  ;;  %v2044_v38 = vpop.f32.mrf.mxu0 }
 0x381   : > { %v2166_v10 = vadd.f32 %v3843_v23, %v2155_v52  ;;  %v2107_v52 = vadd.f32 %v2093_v30, %v2055_v2  ;;  %v2004_v51 = vadd.f32 %v1992_v1, %v1945_v39 }
 0x382   : > { %v1892_v45 = vadd.f32 %v3831_v19, %v1835_v58 }
 0x383   : > { %v2174_v9 = vmax.f32 %v2166_v10, 0.0  ;;  %v2056_v0 = vadd.f32 %v2044_v38, %v2004_v51 }
 0x384   : > { %v1946_v10 = vadd.f32 %v3837_v24, %v1892_v45 }
 0x385   : > { %v2196_v22 = vrot.slane %v2174_v9, 1  ;;  %2752 = vmatmul.msk.f32.gmra.mxu0 %vm1085_vm5, %v2174_v9  ;;  %2759 = vmatmul.msk.f32.vlgmr.msrb.gmra.mxu1 %vm1085_vm5, %v2174_v9  ;;  %v1995_v9 = vpop.f32.mrf.mxu3 }
 0x386   : > { %v2136_v31 = vpop.f32.mrf.mxu2  ;;  %v2005_v55 = vadd.f32 %v1995_v9, %v1946_v10 }
 0x387   : > { %v2156_v25 = vadd.f32 %v2136_v31, %v2104_v34  ;;  %v2197_v37 = vsel %vm510_vm1, %v2196_v22, %v3212_v3  ;;  %v2108_v34 = vadd.f32 %v2096_v32, %v2056_v0 }
 0x388   : > { %2744 = vmatmul.msk.f32.gmra.mxu3 %vm1085_vm5, %v2197_v37  ;;  %2766 = vmatmul.msk.f32.vlgmr.msrb.gmra.mxu2 %vm1085_vm5, %v2197_v37  ;;  %v2047_v19 = vpop.f32.mrf.mxu0  ;;  %v2099_v37 = vpop.f32.mrf.mxu1 }
 0x389   : > { %v2167_v53 = vadd.f32 %v3843_v23, %v2156_v25  ;;  %v2057_v24 = vadd.f32 %v2047_v19, %v2005_v55 }
 0x38b   : > { %v2175_v21 = vmax.f32 %v2167_v53, 0.0  ;;  %v2109_v57 = vadd.f32 %v2099_v37, %v2057_v24 }
 0x38d   : > { %v2198_v56 = vrot.slane %v2175_v21, 1  ;;  %2753 = vmatmul.msk.f32.gmra.mxu0 %vm1085_vm5, %v2175_v21  ;;  %2760 = vmatmul.msk.f32.gmra.mxu1 %vm1085_vm5, %v2175_v21 }
 0x38e   : > { %v2139_v46 = vpop.f32.mrf.mxu2 }
 0x38f   : > { %v2157_v28 = vadd.f32 %v2139_v46, %v2105_v42  ;;  %v2199_v27 = vsel %vm510_vm1, %v2198_v56, %v3212_v3 }
 0x390   : > { %2745 = vmatmul.msk.f32.gmra.mxu3 %vm1085_vm5, %v2199_v27  ;;  %2767 = vmatmul.msk.f32.gmra.mxu2 %vm1085_vm5, %v2199_v27 }
 0x391   : > { %v2168_v20 = vadd.f32 %v3843_v23, %v2157_v28 }
 0x393   : > { %v2176_v15 = vmax.f32 %v2168_v20, 0.0 }
 0x395   : > { %v2200_v48 = vrot.slane %v2176_v15, 1  ;;  %2754 = vmatmul.msk.f32.gmra.mxu0 %vm1085_vm5, %v2176_v15  ;;  %2761 = vmatmul.msk.f32.gmra.mxu1 %vm1085_vm5, %v2176_v15 }
 0x396   : > { %v2142_v36 = vpop.f32.mrf.mxu2 }
 0x397   : > { %v2158_v54 = vadd.f32 %v2142_v36, %v2106_v4  ;;  %v2201_v13 = vsel %vm510_vm1, %v2200_v48, %v3212_v3 }
 0x398   : > { %2746 = vmatmul.msk.f32.gmra.mxu3 %vm1085_vm5, %v2201_v13  ;;  %2768 = vmatmul.msk.f32.gmra.mxu2 %vm1085_vm5, %v2201_v13 }
 0x399   : > { %v2169_v59 = vadd.f32 %v3843_v23, %v2158_v54 }
 0x39b   : > { %v2177_v49 = vmax.f32 %v2169_v59, 0.0 }
 0x39d   : > { %v2202_v40 = vrot.slane %v2177_v49, 1  ;;  %2755 = vmatmul.msk.f32.gmra.mxu0 %vm1085_vm5, %v2177_v49  ;;  %2762 = vmatmul.msk.f32.gmra.mxu1 %vm1085_vm5, %v2177_v49 }
 0x39e   : > { %v2145_v17 = vpop.f32.mrf.mxu2 }
 0x39f   : > { %v2159_v50 = vadd.f32 %v2145_v17, %v2107_v52  ;;  %v2203_v41 = vsel %vm510_vm1, %v2202_v40, %v3212_v3 }
 0x3a0   : > { %2747 = vmatmul.msk.f32.gmra.mxu3 %vm1085_vm5, %v2203_v41  ;;  %2769 = vmatmul.msk.f32.gmra.mxu2 %vm1085_vm5, %v2203_v41 }
 0x3a1   : > { %v2170_v44 = vadd.f32 %v3843_v23, %v2159_v50 }
 0x3a3   : > { %v2178_v14 = vmax.f32 %v2170_v44, 0.0 }
 0x3a5   : > { %v2204_v22 = vrot.slane %v2178_v14, 1  ;;  %2756 = vmatmul.msk.f32.gmra.mxu0 %vm1085_vm5, %v2178_v14  ;;  %2763 = vmatmul.msk.f32.gmra.mxu1 %vm1085_vm5, %v2178_v14 }
 0x3a6   : > { %v2148_v31 = vpop.f32.mrf.mxu2 }
 0x3a7   : > { %v2160_v12 = vadd.f32 %v2148_v31, %v2108_v34  ;;  %v2205_v63 = vsel %vm510_vm1, %v2204_v22, %v3212_v3 }
 0x3a8   : > { %2748 = vmatmul.msk.f32.gmra.mxu3 %vm1085_vm5, %v2205_v63  ;;  %2770 = vmatmul.msk.f32.gmra.mxu2 %vm1085_vm5, %v2205_v63 }
 0x3a9   : > { %v2171_v25 = vadd.f32 %v3843_v23, %v2160_v12 }
 0x3ab   : > { %v2179_v43 = vmax.f32 %v2171_v25, 0.0 }
 0x3ad   : > { %v2206_v53 = vrot.slane %v2179_v43, 1  ;;  %2757 = vmatmul.msk.f32.gmra.mxu0 %vm1085_vm5, %v2179_v43  ;;  %2764 = vmatmul.msk.f32.gmra.mxu1 %vm1085_vm5, %v2179_v43 }
 0x3ae   : > { %v2151_v7 = vpop.f32.mrf.mxu2 }
 0x3af   : > { %v2161_v33 = vadd.f32 %v2151_v7, %v2109_v57  ;;  %v2207_v21 = vsel %vm510_vm1, %v2206_v53, %v3212_v3 }
 0x3b0   : > { %2749 = vmatmul.msk.f32.gmra.mxu3 %vm1085_vm5, %v2207_v21  ;;  %2771 = vmatmul.msk.f32.gmra.mxu2 %vm1085_vm5, %v2207_v21 }
 0x3b1   : > { %v2172_v42 = vadd.f32 %v3843_v23, %v2161_v33 }
 0x3b3   : > { %v2180_v62 = vmax.f32 %v2172_v42, 0.0 }
 0x3b5   : > { %v2208_v26 = vrot.slane %v2180_v62, 1  ;;  %2758 = vmatmul.msk.f32.gmra.mxu0 %vm1085_vm5, %v2180_v62  ;;  %2765 = vmatmul.msk.f32.gmra.mxu1 %vm1085_vm5, %v2180_v62 }
 0x3b7   : > { %v2209_v56 = vsel %vm510_vm1, %v2208_v26, %v3212_v3 }
 0x3b8   : > { %2750 = vmatmul.msk.f32.gmra.mxu3 %vm1085_vm5, %v2209_v56  ;;  %2772 = vmatmul.msk.f32.gmra.mxu2 %vm1085_vm5, %v2209_v56 }
 0x3bd   : > { %2361 = vmatmul.f32.gmra.mxu1 %v2808_v61 }
 0x3c0   : > { %2773 = vmatmul.msk.f32.gmra.mxu2 %vm1085_vm5, %v3212_v3 }
 0x3fa   : > { %v2300_v23 = vpop.f32.mrf.mxu0 }
 0x402   : > { %v2303_v16 = vpop.f32.mrf.mxu0  ;;  %v2341_v46 = vpop.f32.mrf.mxu1 }
 0x403   : > { %v2243_v6 = vpop.f32.mrf.mxu3 }
 0x404   : > { %v2301_v18 = vadd.f32 %v2300_v23, %v2243_v6 }
 0x406   : > { %v2365_v29 = vadd.f32 %v2341_v46, %v2301_v18 }
 0x40a   : > { %v2306_v28 = vpop.f32.mrf.mxu0  ;;  %v2344_v27 = vpop.f32.mrf.mxu1 }
 0x40b   : > { %v2246_v20 = vpop.f32.mrf.mxu3  ;;  %v2390_v8 = vpop.f32.mrf.mxu2 }
 0x40c   : > { %v2414_v61 = vadd.f32 %v2390_v8, %v2365_v29  ;;  %v2304_v15 = vadd.f32 %v2303_v16, %v2246_v20 }
 0x40e   : > { %v2425_v3 = vadd.f32 %v3925_v11, %v2414_v61  ;;  %v2366_v47 = vadd.f32 %v2344_v27, %v2304_v15 }
 0x410   : > { %v2433_v5 = vmax.f32 %v2425_v3, 0.0 }
 0x412   : > { %2442 = vst.msk [vmem:[%s3932_s14] sm:$0xff] %vm2441_vm6, %v2433_v5  ;;  %v2347_v4 = vpop.f32.mrf.mxu1  ;;  %v2309_v35 = vpop.f32.mrf.mxu0 }
 0x413   : > { %v2249_v48 = vpop.f32.mrf.mxu3  ;;  %v2393_v36 = vpop.f32.mrf.mxu2 }
 0x414   : > { %v2415_v60 = vadd.f32 %v2393_v36, %v2366_v47  ;;  %v2307_v54 = vadd.f32 %v2306_v28, %v2249_v48 }
 0x416   : > { %v2426_v13 = vadd.f32 %v3925_v11, %v2415_v60  ;;  %v2367_v2 = vadd.f32 %v2347_v4, %v2307_v54 }
 0x418   : > { %v2434_v30 = vmax.f32 %v2426_v13, 0.0 }
 0x41a   : > { %2443 = vst.msk [vmem:[%s3932_s14 + $0x8] sm:$0xff] %vm2441_vm6, %v2434_v30  ;;  %v2350_v1 = vpop.f32.mrf.mxu1  ;;  %v2312_v49 = vpop.f32.mrf.mxu0 }
 0x41b   : > { %v2252_v39 = vpop.f32.mrf.mxu3  ;;  %v2396_v59 = vpop.f32.mrf.mxu2 }
 0x41c   : > { %v2416_v58 = vadd.f32 %v2396_v59, %v2367_v2  ;;  %v2310_v52 = vadd.f32 %v2309_v35, %v2252_v39 }
 0x41e   : > { %v2427_v51 = vadd.f32 %v3925_v11, %v2416_v58  ;;  %v2368_v17 = vadd.f32 %v2350_v1, %v2310_v52 }
 0x420   : > { %v2435_v40 = vmax.f32 %v2427_v51, 0.0 }
 0x422   : > { %2444 = vst.msk [vmem:[%s3932_s14 + $0x10] sm:$0xff] %vm2441_vm6, %v2435_v40  ;;  %v2353_v38 = vpop.f32.mrf.mxu1  ;;  %v2315_v44 = vpop.f32.mrf.mxu0 }
 0x423   : > { %v2255_v45 = vpop.f32.mrf.mxu3  ;;  %v2399_v50 = vpop.f32.mrf.mxu2 }
 0x424   : > { %v2417_v41 = vadd.f32 %v2399_v50, %v2368_v17  ;;  %v2313_v0 = vadd.f32 %v2312_v49, %v2255_v45 }
 0x426   : > { %v2428_v10 = vadd.f32 %v3925_v11, %v2417_v41  ;;  %v2369_v9 = vadd.f32 %v2353_v38, %v2313_v0 }
 0x428   : > { %v2436_v32 = vmax.f32 %v2428_v10, 0.0 }
 0x42a   : > { %2445 = vst.msk [vmem:[%s3932_s14 + $0x18] sm:$0xff] %vm2441_vm6, %v2436_v32  ;;  %v2356_v22 = vpop.f32.mrf.mxu1  ;;  %v2318_v63 = vpop.f32.mrf.mxu0 }
 0x42b   : > { %v2258_v14 = vpop.f32.mrf.mxu3  ;;  %v2402_v34 = vpop.f32.mrf.mxu2 }
 0x42c   : > { %v2418_v55 = vadd.f32 %v2402_v34, %v2369_v9  ;;  %v2316_v19 = vadd.f32 %v2315_v44, %v2258_v14 }
 0x42e   : > { %v2429_v31 = vadd.f32 %v3925_v11, %v2418_v55  ;;  %v2370_v24 = vadd.f32 %v2356_v22, %v2316_v19 }
 0x430   : > { %v2437_v12 = vmax.f32 %v2429_v31, 0.0 }
 0x432   : > { %2446 = vst.msk [vmem:[%s3932_s14 + $0x20] sm:$0xff] %vm2441_vm6, %v2437_v12  ;;  %v2359_v7 = vpop.f32.mrf.mxu1  ;;  %v2321_v56 = vpop.f32.mrf.mxu0 }
 0x433   : > { %v2261_v25 = vpop.f32.mrf.mxu3  ;;  %v2405_v37 = vpop.f32.mrf.mxu2 }
 0x434   : > { %v2419_v43 = vadd.f32 %v2405_v37, %v2370_v24  ;;  %v2319_v57 = vadd.f32 %v2318_v63, %v2261_v25 }
 0x436   : > { %v2430_v53 = vadd.f32 %v3925_v11, %v2419_v43  ;;  %v2371_v21 = vadd.f32 %v2359_v7, %v2319_v57 }
 0x438   : > { %v2438_v33 = vmax.f32 %v2430_v53, 0.0 }
 0x43a   : > { %2447 = vst.msk [vmem:[%s3932_s14 + $0x28] sm:$0xff] %vm2441_vm6, %v2438_v33  ;;  %v2362_v46 = vpop.f32.mrf.mxu1 }
 0x43b   : > { %v2264_v42 = vpop.f32.mrf.mxu3  ;;  %v2408_v62 = vpop.f32.mrf.mxu2 }
 0x43c   : > { %v2420_v26 = vadd.f32 %v2408_v62, %v2371_v21  ;;  %v2322_v23 = vadd.f32 %v2321_v56, %v2264_v42 }
 0x43e   : > { %v2431_v16 = vadd.f32 %v3925_v11, %v2420_v26  ;;  %v2372_v18 = vadd.f32 %v2362_v46, %v2322_v23 }
 0x440   : > { %v2439_v6 = vmax.f32 %v2431_v16, 0.0 }
 0x442   : > { %2448 = vst.msk [vmem:[%s3932_s14 + $0x30] sm:$0xff] %vm2441_vm6, %v2439_v6 }
 0x443   : > { %v2411_v28 = vpop.f32.mrf.mxu2 }
 0x444   : > { %v2421_v27 = vadd.f32 %v2411_v28, %v2372_v18 }
 0x446   : > { %v2432_v29 = vadd.f32 %v3925_v11, %v2421_v27 }
 0x448   : > { %v2440_v20 = vmax.f32 %v2432_v29, 0.0 }
 0x44a   : > { %2449 = vst.msk [vmem:[%s3932_s14 + $0x38] sm:$0xff] %vm2441_vm6, %v2440_v20 }
 0x44b PF: > { %s19_s30 = sadd.s32 1, %s2803_s30  }
 0x44c   : > { %p16_p4 = scmp.ge.s32.totalorder %s19_s30, 4  }
 0x44e   :  { %18 = sbr.rel (!%p16_p4) target bundleno = 1 (0x1), region = 86 }

</bundles_post_ra>
